<compile_context>
chip_gen: v6e
topology: v6e:2x2x1
jax: 0.10.0
libtpu: 0.0.40
codegen_flags: <defaults>
</compile_context>

<pallas_src>
import jax
import jax.numpy as jnp
from jax.experimental import pallas as pl
from jax.experimental.pallas import tpu as pltpu

BN_EPS = 1e-5


# --------------------------------------------------------------------------
# Pallas kernel factory: all four inception branches for a tile of rows.
# Static channel splits are baked in via closure.
# --------------------------------------------------------------------------
def _make_inception_kernel(c1, c2a, c3a, c4, cout2):
    split_h2 = c1
    split_h3 = c1 + c2a
    split_o4 = c1 + c2a + c3a
    first_half = c1 + cout2          # 64 + 64 = 128 -> lane-aligned store boundary

    def kernel(x_ref,
               wh_ref, bh_ref,
               w2b_ref, b2b_ref,
               w3b_ref, b3b_ref,
               w3c_ref, b3c_ref,
               out_ref):
        xf = x_ref[...]                                  # (Rt, W, Cin) f32
        _, w_len, _ = xf.shape

        # Hoisted W-boundary masks, computed ONCE per tile as (1, W, 1) and
        # broadcast inside the selects (JAX does not CSE broadcasts).
        iota_w = jax.lax.broadcasted_iota(jnp.int32, (1, w_len, 1), 1)
        is_first = iota_w == 0
        is_last = iota_w == (w_len - 1)

        def mm(h_bf16, w_ref_):
            # (Rt, W, K) bf16 activation -> MXU matmul with bf16 weight, f32 acc.
            r, s, k = h_bf16.shape
            wmat = w_ref_[...]                           # (K, N) bf16
            y = jnp.dot(h_bf16.reshape(r * s, k), wmat,
                        preferred_element_type=jnp.float32)
            return y.reshape(r, s, wmat.shape[-1])

        def bias_relu(y, b_ref_):
            return jnp.maximum(y + b_ref_[...].reshape(1, 1, -1), 0.0)

        # Shifts use pltpu.roll (XLU) + boundary select; zero-pad semantics of the
        # (1,3) convs.  Kept in f32 (roll), cast to bf16 only for the concat/MXU.
        def shift_prev(h):   # out[:, w] = h[:, w-1]; zero at w == 0
            return jnp.where(is_first, 0.0, pltpu.roll(h, shift=1, axis=1))

        def shift_next(h):   # out[:, w] = h[:, w+1]; zero at w == W-1
            return jnp.where(is_last, 0.0, pltpu.roll(h, shift=w_len - 1, axis=1))

        def conv1x3(h_f32, w_ref_, b_ref_):
            # Single matmul over [h(w-1), h(w), h(w+1)] with a (3*Ci, Co) weight.
            cat = jnp.concatenate([shift_prev(h_f32).astype(jnp.bfloat16),
                                   h_f32.astype(jnp.bfloat16),
                                   shift_next(h_f32).astype(jnp.bfloat16)],
                                  axis=-1)
            return bias_relu(mm(cat, w_ref_), b_ref_)

        # ---- branch-4 maxpool (1,3)/stride 1/pad (0,1); boundary fill = x
        #      itself (max(x, x) = x, matching -inf padding semantics).
        xp = jnp.where(is_first, xf, pltpu.roll(xf, shift=1, axis=1))
        xn = jnp.where(is_last, xf, pltpu.roll(xf, shift=w_len - 1, axis=1))
        mp = jnp.maximum(jnp.maximum(xf, xp), xn)

        # ---- fused head matmul: branch1 + branch2-head + branch3-head + branch4
        #      1x1 convs on cat([x, maxpool(x)]) with a block-diagonal
        #      (2*Cin, c1+c2a+c3a+c4) weight.
        head_in = jnp.concatenate([xf.astype(jnp.bfloat16),
                                   mp.astype(jnp.bfloat16)], axis=-1)
        y = bias_relu(mm(head_in, wh_ref), bh_ref)       # (Rt, W, 208) f32
        out1 = y[:, :, :split_h2]
        h2 = y[:, :, split_h2:split_h3]
        h3 = y[:, :, split_h3:split_o4]
        out4 = y[:, :, split_o4:]

        # ---- branch 2: (1,3) conv; store the first 128 output lanes early so
        #      their writeback overlaps branch 3's two chained matmuls.
        out2 = conv1x3(h2, w2b_ref, b2b_ref)
        out_ref[:, :, :first_half] = jnp.concatenate(
            [out1, out2], axis=-1).astype(out_ref.dtype)

        # ---- branch 3: (1,3) conv -> (1,3) conv; second 128 output lanes.
        h3b = conv1x3(h3, w3b_ref, b3b_ref)
        out3 = conv1x3(h3b, w3c_ref, b3c_ref)
        out_ref[:, :, first_half:] = jnp.concatenate(
            [out3, out4], axis=-1).astype(out_ref.dtype)

    return kernel


# --------------------------------------------------------------------------
# Wrapper: tiling + pallas_call.  Core API is (R, W, C) -> (R, W, 256).
# --------------------------------------------------------------------------
def _choose_tile_rows(R, W, per_elem_bytes, *, target_m=2048,
                      vmem_budget_bytes=10 * 1024 * 1024, min_grid_steps=4):
    """Pick tile_rows: keep M per matmul decent but VMEM per tile ~<= budget and
    give the grid >= min_grid_steps steps (>= 2 per TensorCore on v7x)."""
    w = max(W, 1)
    cap = max(1, min(target_m // w,
                     vmem_budget_bytes // max(1, per_elem_bytes * w)))
    if R > min_grid_steps:
        cap = min(cap, pl.cdiv(R, min_grid_steps))
    return max(1, min(cap, R))


def dct_inception_block_rwc(x_rwc, params):
    """x_rwc: (R, W, Cin) float32.  Returns (R, W, 256) float32."""
    R, W, C = x_rwc.shape
    names = ("wh", "bh", "w2b", "b2b", "w3b", "b3b", "w3c", "b3c")
    plist = [params[n] for n in names]

    c1 = int(params["c1"])
    c4 = int(params["c4"])
    c2a = params["w2b"].shape[0] // 3
    c3a = params["w3b"].shape[0] // 3
    cout2 = params["w2b"].shape[1]
    cout3 = params["w3c"].shape[1]
    cout_total = c1 + cout2 + cout3 + c4

    # Rough per-element VMEM: double-buffered f32 I/O tiles + bf16/f32 live temps
    # (head input, cat tensors, branch intermediates).  Kept conservative so the
    # same tile comfortably fits the default 32 MiB scoped VMEM on v5e/v6e/v7x.
    per_elem_bytes = 8 * (C + cout_total) + 4 * 1500
    tile_rows = _choose_tile_rows(R, W, per_elem_bytes)

    # Non-divisor R: pad rows up to a tile multiple (padded rows are sliced off).
    n_steps = pl.cdiv(R, tile_rows)
    r_pad = n_steps * tile_rows
    x_in = x_rwc if r_pad == R else jnp.pad(
        x_rwc, ((0, r_pad - R), (0, 0), (0, 0)))

    kernel = _make_inception_kernel(c1, c2a, c3a, c4, cout2)

    def full_spec(a):
        nd = a.ndim
        return pl.BlockSpec(a.shape, lambda i, _n=nd: (0,) * _n)

    out = pl.pallas_call(
        kernel,
        out_shape=jax.ShapeDtypeStruct((r_pad, W, cout_total), jnp.float32),
        grid_spec=pltpu.PrefetchScalarGridSpec(
            num_scalar_prefetch=0,
            grid=(n_steps,),
            in_specs=[pl.BlockSpec((tile_rows, W, C), lambda i: (i, 0, 0))]
                     + [full_spec(p) for p in plist],
            out_specs=pl.BlockSpec((tile_rows, W, cout_total),
                                   lambda i: (i, 0, 0)),
        ),
        compiler_params=pltpu.CompilerParams(
            dimension_semantics=("parallel",)),
    )(x_in, *plist)
    return out if r_pad == R else out[:R]


def dct_inception_block(x_nhcw, params):
    """Compatibility wrapper matching the PyTorch module layout:
    (N,H,C,W) -> (N,H,256,W).

    NOTE: the two transposes cost an extra HBM round trip; pipelines that can
    keep activations in (R, W, C) should call dct_inception_block_rwc directly.
    """
    N, H, C, W = x_nhcw.shape
    x_rwc = jnp.transpose(x_nhcw, (0, 1, 3, 2)).reshape(N * H, W, C)
    out = dct_inception_block_rwc(x_rwc, params)
    out = out.reshape(N, H, W, -1)
    return jnp.transpose(out, (0, 1, 3, 2))


# --------------------------------------------------------------------------
# Deterministic parameter init (conv + BN, shapes per the PyTorch module),
# BN folding and host-side weight fusion.
# --------------------------------------------------------------------------
def _make_conv_bn(key, cin, cout, k):
    kw, kb, kg, kbe, km, kv = jax.random.split(key, 6)
    return dict(
        weight=jax.random.normal(kw, (cout, cin, 1, k), jnp.float32) / jnp.sqrt(cin * k),
        bias=0.1 * jax.random.normal(kb, (cout,), jnp.float32),
        gamma=1.0 + 0.1 * jax.random.normal(kg, (cout,), jnp.float32),
        beta=0.1 * jax.random.normal(kbe, (cout,), jnp.float32),
        mean=0.1 * jax.random.normal(km, (cout,), jnp.float32),
        var=jax.random.uniform(kv, (cout,), jnp.float32, minval=0.5, maxval=1.5),
    )


def init_raw_params(key, in_channel):
    ks = jax.random.split(key, 7)
    return dict(
        b1=_make_conv_bn(ks[0], in_channel, 64, 1),
        b2a=_make_conv_bn(ks[1], in_channel, 48, 1),
        b2b=_make_conv_bn(ks[2], 48, 64, 3),
        b3a=_make_conv_bn(ks[3], in_channel, 64, 1),
        b3b=_make_conv_bn(ks[4], 64, 96, 3),
        b3c=_make_conv_bn(ks[5], 96, 96, 3),
        b4=_make_conv_bn(ks[6], in_channel, 32, 1),
    )


def _fold_conv_bn(p):
    scale = p["gamma"] / jnp.sqrt(p["var"] + BN_EPS)
    # (cout, cin, 1, k) -> (k, cin, cout), BN scale folded in
    w = jnp.transpose(p["weight"][:, :, 0, :], (2, 1, 0)) * scale[None, None, :]
    b = ((p["bias"] - p["mean"]) * scale + p["beta"]).reshape(1, -1)
    return w, b


def fuse_block_params(raw, matmul_dtype=jnp.bfloat16):
    f = {name: _fold_conv_bn(raw[name]) for name in raw}
    w1, b1 = f["b1"]
    w2a, b2a = f["b2a"]
    w2b, b2b = f["b2b"]
    w3a, b3a = f["b3a"]
    w3b, b3b = f["b3b"]
    w3c, b3c = f["b3c"]
    w4, b4 = f["b4"]

    cin = w1.shape[1]
    c1, c2a, c3a, c4 = w1.shape[2], w2a.shape[2], w3a.shape[2], w4.shape[2]

    # Fused head weight (block diagonal) applied to cat([x, maxpool(x)]):
    #   rows [0, cin)     : [ w1 | w2a | w3a | 0  ]
    #   rows [cin, 2*cin) : [ 0  | 0   | 0   | w4 ]
    top = jnp.concatenate(
        [w1[0], w2a[0], w3a[0], jnp.zeros((cin, c4), jnp.float32)], axis=1)
    bot = jnp.concatenate(
        [jnp.zeros((cin, c1 + c2a + c3a), jnp.float32), w4[0]], axis=1)
    wh = jnp.concatenate([top, bot], axis=0)

    def cast(w):
        return w.astype(matmul_dtype)

    return dict(
        wh=cast(wh),                                        # (2*Cin, 208) bf16
        bh=jnp.concatenate([b1, b2a, b3a, b4], axis=1),     # (1, 208) f32
        # (1,3) convs with taps fused along the contraction dim: (3*Ci, Co)
        w2b=cast(w2b.reshape(-1, w2b.shape[-1])), b2b=b2b,  # (144, 64)
        w3b=cast(w3b.reshape(-1, w3b.shape[-1])), b3b=b3b,  # (192, 96)
        w3c=cast(w3c.reshape(-1, w3c.shape[-1])), b3c=b3c,  # (288, 96)
        c1=c1, c4=c4,
    )


# --------------------------------------------------------------------------
# Pure-JAX reference mirroring the PyTorch forward (eval-mode BN), all f32.
# --------------------------------------------------------------------------
def reference(x, raw):
    h = jnp.transpose(x, (0, 2, 1, 3))                 # NCHW

    def cbr(h, p, pad):
        y = jax.lax.conv_general_dilated(
            h, p["weight"], (1, 1), ((0, 0), (pad, pad)),
            dimension_numbers=("NCHW", "OIHW", "NCHW"))
        y = y + p["bias"][None, :, None, None]
        scale = p["gamma"] / jnp.sqrt(p["var"] + BN_EPS)
        y = ((y - p["mean"][None, :, None, None]) * scale[None, :, None, None]
             + p["beta"][None, :, None, None])
        return jnp.maximum(y, 0.0)

    out1 = cbr(h, raw["b1"], 0)
    out2 = cbr(cbr(h, raw["b2a"], 0), raw["b2b"], 1)
    out3 = cbr(cbr(cbr(h, raw["b3a"], 0), raw["b3b"], 1), raw["b3c"], 1)
    mp = jax.lax.reduce_window(h, -jnp.inf, jax.lax.max,
                               (1, 1, 1, 3), (1, 1, 1, 1),
                               ((0, 0), (0, 0), (0, 0), (1, 1)))
    out4 = cbr(mp, raw["b4"], 0)
    out = jnp.concatenate([out1, out2, out3, out4], axis=1)
    return jnp.transpose(out, (0, 2, 1, 3))            # (N, H, Cout, W)


if __name__ == "__main__":
    key = jax.random.PRNGKey(0)
    kx, kp = jax.random.split(key)
    N, H, C, W = 2, 8, 32, 16                          # small in_channel=32 instance
    x = jax.random.normal(kx, (N, H, C, W), jnp.float32)
    raw = init_raw_params(kp, C)
    params = fuse_block_params(raw)

    out = jax.block_until_ready(dct_inception_block(x, params))
    assert out.shape == (N, H, 256, W), out.shape

    ref = reference(x, raw)
    err = float(jnp.max(jnp.abs(out - ref)))
    scale = float(jnp.max(jnp.abs(ref)))
    # bf16 matmul inputs -> compare against the f32 reference with a relative bound.
    if err > 0.05 * scale + 1e-2:
        raise AssertionError(f"mismatch vs reference: max abs err {err}, ref max {scale}")
    print("KERNEL_OK")
</pallas_src>

<mosaic_0001>
module attributes {stable_mosaic.version = 11 : i64} {
  func.func @kernel(%arg0: i32, %arg1: memref<4x16x32xf32, #tpu.memory_space<vmem>>, %arg2: memref<64x208xbf16, #tpu.memory_space<vmem>>, %arg3: memref<1x208xf32, #tpu.memory_space<vmem>>, %arg4: memref<144x64xbf16, #tpu.memory_space<vmem>>, %arg5: memref<1x64xf32, #tpu.memory_space<vmem>>, %arg6: memref<192x96xbf16, #tpu.memory_space<vmem>>, %arg7: memref<1x96xf32, #tpu.memory_space<vmem>>, %arg8: memref<288x96xbf16, #tpu.memory_space<vmem>>, %arg9: memref<1x96xf32, #tpu.memory_space<vmem>>, %arg10: memref<4x16x256xf32, #tpu.memory_space<vmem>>) attributes {dimension_semantics = [#tpu.dimension_semantics<parallel>], iteration_bounds = array<i64: 4>, scalar_prefetch = 0 : i64, scratch_operands = 0 : i64, tpu.core_type = #tpu.core_type<tc>, window_params = [{transform_indices = @transform_0, window_bounds = array<i64: 4, 16, 32>}, {pipeline_mode = #tpu.pipeline_mode<synchronous>, transform_indices = @transform_1, window_bounds = array<i64: 64, 208>}, {pipeline_mode = #tpu.pipeline_mode<synchronous>, transform_indices = @transform_2, window_bounds = array<i64: 1, 208>}, {pipeline_mode = #tpu.pipeline_mode<synchronous>, transform_indices = @transform_3, window_bounds = array<i64: 144, 64>}, {pipeline_mode = #tpu.pipeline_mode<synchronous>, transform_indices = @transform_4, window_bounds = array<i64: 1, 64>}, {pipeline_mode = #tpu.pipeline_mode<synchronous>, transform_indices = @transform_5, window_bounds = array<i64: 192, 96>}, {pipeline_mode = #tpu.pipeline_mode<synchronous>, transform_indices = @transform_6, window_bounds = array<i64: 1, 96>}, {pipeline_mode = #tpu.pipeline_mode<synchronous>, transform_indices = @transform_7, window_bounds = array<i64: 288, 96>}, {pipeline_mode = #tpu.pipeline_mode<synchronous>, transform_indices = @transform_8, window_bounds = array<i64: 1, 96>}, {transform_indices = @transform_9, window_bounds = array<i64: 4, 16, 256>}]} {
    %c0 = arith.constant 0 : index
    %c0_0 = arith.constant 0 : index
    %c0_1 = arith.constant 0 : index
    %0 = vector.load %arg1[%c0, %c0_0, %c0_1] : memref<4x16x32xf32, #tpu.memory_space<vmem>>, vector<4x16x32xf32>
    %1 = tpu.iota {dimensions = array<i32: 1>} : vector<1x16x1xi32>
    %c0_i32 = arith.constant 0 : i32
    %2 = vector.broadcast %c0_i32 : i32 to vector<1x16x1xi32>
    %3 = arith.cmpi eq, %1, %2 : vector<1x16x1xi32>
    %c15_i32 = arith.constant 15 : i32
    %4 = vector.broadcast %c15_i32 : i32 to vector<1x16x1xi32>
    %5 = arith.cmpi eq, %1, %4 : vector<1x16x1xi32>
    %c1_i32 = arith.constant 1 : i32
    %6 = tpu.dynamic_rotate %0 by %c1_i32 dim 1 : vector<4x16x32xf32>, i32 -> vector<4x16x32xf32>
    %7 = vector.shape_cast %3 : vector<1x16x1xi1> to vector<1x16x1xi1>
    %8 = vector.broadcast %7 : vector<1x16x1xi1> to vector<4x16x32xi1>
    %9 = arith.select %8, %0, %6 : vector<4x16x32xi1>, vector<4x16x32xf32>
    %c15_i32_2 = arith.constant 15 : i32
    %10 = tpu.dynamic_rotate %0 by %c15_i32_2 dim 1 : vector<4x16x32xf32>, i32 -> vector<4x16x32xf32>
    %11 = vector.shape_cast %5 : vector<1x16x1xi1> to vector<1x16x1xi1>
    %12 = vector.broadcast %11 : vector<1x16x1xi1> to vector<4x16x32xi1>
    %13 = arith.select %12, %0, %10 : vector<4x16x32xi1>, vector<4x16x32xf32>
    %14 = arith.maximumf %0, %9 : vector<4x16x32xf32>
    %15 = arith.maximumf %14, %13 : vector<4x16x32xf32>
    %16 = arith.truncf %0 : vector<4x16x32xf32> to vector<4x16x32xbf16>
    %17 = arith.truncf %15 : vector<4x16x32xf32> to vector<4x16x32xbf16>
    %18 = tpu.concatenate %16, %17 in 2 : vector<4x16x32xbf16>, vector<4x16x32xbf16> -> vector<4x16x64xbf16>
    %c0_3 = arith.constant 0 : index
    %c0_4 = arith.constant 0 : index
    %19 = vector.load %arg2[%c0_3, %c0_4] : memref<64x208xbf16, #tpu.memory_space<vmem>>, vector<64x208xbf16>
    %20 = vector.shape_cast %18 : vector<4x16x64xbf16> to vector<64x64xbf16>
    %cst = arith.constant dense<0.000000e+00> : vector<64x208xf32>
    %21 = tpu.matmul %20, %19, %cst {dimension_numbers = #tpu.dot_dimension_numbers<[1], [0], [0], [1], [0, 0, 1, 1], [], []>} : vector<64x64xbf16>, vector<64x208xbf16>, vector<64x208xf32> -> vector<64x208xf32>
    %22 = vector.shape_cast %21 : vector<64x208xf32> to vector<4x16x208xf32>
    %c0_5 = arith.constant 0 : index
    %c0_6 = arith.constant 0 : index
    %23 = vector.load %arg3[%c0_5, %c0_6] : memref<1x208xf32, #tpu.memory_space<vmem>>, vector<1x208xf32>
    %24 = vector.shape_cast %23 : vector<1x208xf32> to vector<1x1x208xf32>
    %25 = vector.broadcast %24 : vector<1x1x208xf32> to vector<4x16x208xf32>
    %26 = arith.addf %22, %25 : vector<4x16x208xf32>
    %cst_7 = arith.constant 0.000000e+00 : f32
    %27 = vector.broadcast %cst_7 : f32 to vector<4x16x208xf32>
    %28 = arith.maximumf %26, %27 : vector<4x16x208xf32>
    %29 = vector.extract_strided_slice %28 {offsets = [0, 0, 0], sizes = [4, 16, 64], strides = [1, 1, 1]} : vector<4x16x208xf32> to vector<4x16x64xf32>
    %30 = vector.extract_strided_slice %28 {offsets = [0, 0, 64], sizes = [4, 16, 48], strides = [1, 1, 1]} : vector<4x16x208xf32> to vector<4x16x48xf32>
    %31 = vector.extract_strided_slice %28 {offsets = [0, 0, 112], sizes = [4, 16, 64], strides = [1, 1, 1]} : vector<4x16x208xf32> to vector<4x16x64xf32>
    %32 = vector.extract_strided_slice %28 {offsets = [0, 0, 176], sizes = [4, 16, 32], strides = [1, 1, 1]} : vector<4x16x208xf32> to vector<4x16x32xf32>
    %c1_i32_8 = arith.constant 1 : i32
    %33 = tpu.dynamic_rotate %30 by %c1_i32_8 dim 1 : vector<4x16x48xf32>, i32 -> vector<4x16x48xf32>
    %cst_9 = arith.constant 0.000000e+00 : f32
    %34 = vector.shape_cast %3 : vector<1x16x1xi1> to vector<1x16x1xi1>
    %35 = vector.broadcast %34 : vector<1x16x1xi1> to vector<4x16x48xi1>
    %36 = vector.broadcast %cst_9 : f32 to vector<4x16x48xf32>
    %37 = arith.select %35, %36, %33 : vector<4x16x48xi1>, vector<4x16x48xf32>
    %38 = arith.truncf %37 : vector<4x16x48xf32> to vector<4x16x48xbf16>
    %39 = arith.truncf %30 : vector<4x16x48xf32> to vector<4x16x48xbf16>
    %c15_i32_10 = arith.constant 15 : i32
    %40 = tpu.dynamic_rotate %30 by %c15_i32_10 dim 1 : vector<4x16x48xf32>, i32 -> vector<4x16x48xf32>
    %cst_11 = arith.constant 0.000000e+00 : f32
    %41 = vector.shape_cast %5 : vector<1x16x1xi1> to vector<1x16x1xi1>
    %42 = vector.broadcast %41 : vector<1x16x1xi1> to vector<4x16x48xi1>
    %43 = vector.broadcast %cst_11 : f32 to vector<4x16x48xf32>
    %44 = arith.select %42, %43, %40 : vector<4x16x48xi1>, vector<4x16x48xf32>
    %45 = arith.truncf %44 : vector<4x16x48xf32> to vector<4x16x48xbf16>
    %46 = tpu.concatenate %38, %39, %45 in 2 : vector<4x16x48xbf16>, vector<4x16x48xbf16>, vector<4x16x48xbf16> -> vector<4x16x144xbf16>
    %c0_12 = arith.constant 0 : index
    %c0_13 = arith.constant 0 : index
    %47 = vector.load %arg4[%c0_12, %c0_13] : memref<144x64xbf16, #tpu.memory_space<vmem>>, vector<144x64xbf16>
    %48 = vector.shape_cast %46 : vector<4x16x144xbf16> to vector<64x144xbf16>
    %cst_14 = arith.constant dense<0.000000e+00> : vector<64x64xf32>
    %49 = tpu.matmul %48, %47, %cst_14 {dimension_numbers = #tpu.dot_dimension_numbers<[1], [0], [0], [1], [0, 0, 1, 1], [], []>} : vector<64x144xbf16>, vector<144x64xbf16>, vector<64x64xf32> -> vector<64x64xf32>
    %50 = vector.shape_cast %49 : vector<64x64xf32> to vector<4x16x64xf32>
    %c0_15 = arith.constant 0 : index
    %c0_16 = arith.constant 0 : index
    %51 = vector.load %arg5[%c0_15, %c0_16] : memref<1x64xf32, #tpu.memory_space<vmem>>, vector<1x64xf32>
    %52 = vector.shape_cast %51 : vector<1x64xf32> to vector<1x1x64xf32>
    %53 = vector.broadcast %52 : vector<1x1x64xf32> to vector<4x16x64xf32>
    %54 = arith.addf %50, %53 : vector<4x16x64xf32>
    %cst_17 = arith.constant 0.000000e+00 : f32
    %55 = vector.broadcast %cst_17 : f32 to vector<4x16x64xf32>
    %56 = arith.maximumf %54, %55 : vector<4x16x64xf32>
    %57 = tpu.concatenate %29, %56 in 2 : vector<4x16x64xf32>, vector<4x16x64xf32> -> vector<4x16x128xf32>
    %c0_18 = arith.constant 0 : index
    %c0_19 = arith.constant 0 : index
    %c0_20 = arith.constant 0 : index
    %58 = vector.load %arg10[%c0_18, %c0_19, %c0_20] : memref<4x16x256xf32, #tpu.memory_space<vmem>>, vector<4x16x128xf32>
    tpu.vector_store %arg10[%c0_18, %c0_19, %c0_20], %57 {strides = array<i32>} : memref<4x16x256xf32, #tpu.memory_space<vmem>>, vector<4x16x128xf32>,
    %c1_i32_21 = arith.constant 1 : i32
    %59 = tpu.dynamic_rotate %31 by %c1_i32_21 dim 1 : vector<4x16x64xf32>, i32 -> vector<4x16x64xf32>
    %cst_22 = arith.constant 0.000000e+00 : f32
    %60 = vector.shape_cast %3 : vector<1x16x1xi1> to vector<1x16x1xi1>
    %61 = vector.broadcast %60 : vector<1x16x1xi1> to vector<4x16x64xi1>
    %62 = vector.broadcast %cst_22 : f32 to vector<4x16x64xf32>
    %63 = arith.select %61, %62, %59 : vector<4x16x64xi1>, vector<4x16x64xf32>
    %64 = arith.truncf %63 : vector<4x16x64xf32> to vector<4x16x64xbf16>
    %65 = arith.truncf %31 : vector<4x16x64xf32> to vector<4x16x64xbf16>
    %c15_i32_23 = arith.constant 15 : i32
    %66 = tpu.dynamic_rotate %31 by %c15_i32_23 dim 1 : vector<4x16x64xf32>, i32 -> vector<4x16x64xf32>
    %cst_24 = arith.constant 0.000000e+00 : f32
    %67 = vector.shape_cast %5 : vector<1x16x1xi1> to vector<1x16x1xi1>
    %68 = vector.broadcast %67 : vector<1x16x1xi1> to vector<4x16x64xi1>
    %69 = vector.broadcast %cst_24 : f32 to vector<4x16x64xf32>
    %70 = arith.select %68, %69, %66 : vector<4x16x64xi1>, vector<4x16x64xf32>
    %71 = arith.truncf %70 : vector<4x16x64xf32> to vector<4x16x64xbf16>
    %72 = tpu.concatenate %64, %65, %71 in 2 : vector<4x16x64xbf16>, vector<4x16x64xbf16>, vector<4x16x64xbf16> -> vector<4x16x192xbf16>
    %c0_25 = arith.constant 0 : index
    %c0_26 = arith.constant 0 : index
    %73 = vector.load %arg6[%c0_25, %c0_26] : memref<192x96xbf16, #tpu.memory_space<vmem>>, vector<192x96xbf16>
    %74 = vector.shape_cast %72 : vector<4x16x192xbf16> to vector<64x192xbf16>
    %cst_27 = arith.constant dense<0.000000e+00> : vector<64x96xf32>
    %75 = tpu.matmul %74, %73, %cst_27 {dimension_numbers = #tpu.dot_dimension_numbers<[1], [0], [0], [1], [0, 0, 1, 1], [], []>} : vector<64x192xbf16>, vector<192x96xbf16>, vector<64x96xf32> -> vector<64x96xf32>
    %76 = vector.shape_cast %75 : vector<64x96xf32> to vector<4x16x96xf32>
    %c0_28 = arith.constant 0 : index
    %c0_29 = arith.constant 0 : index
    %77 = vector.load %arg7[%c0_28, %c0_29] : memref<1x96xf32, #tpu.memory_space<vmem>>, vector<1x96xf32>
    %78 = vector.shape_cast %77 : vector<1x96xf32> to vector<1x1x96xf32>
    %79 = vector.broadcast %78 : vector<1x1x96xf32> to vector<4x16x96xf32>
    %80 = arith.addf %76, %79 : vector<4x16x96xf32>
    %cst_30 = arith.constant 0.000000e+00 : f32
    %81 = vector.broadcast %cst_30 : f32 to vector<4x16x96xf32>
    %82 = arith.maximumf %80, %81 : vector<4x16x96xf32>
    %c1_i32_31 = arith.constant 1 : i32
    %83 = tpu.dynamic_rotate %82 by %c1_i32_31 dim 1 : vector<4x16x96xf32>, i32 -> vector<4x16x96xf32>
    %cst_32 = arith.constant 0.000000e+00 : f32
    %84 = vector.shape_cast %3 : vector<1x16x1xi1> to vector<1x16x1xi1>
    %85 = vector.broadcast %84 : vector<1x16x1xi1> to vector<4x16x96xi1>
    %86 = vector.broadcast %cst_32 : f32 to vector<4x16x96xf32>
    %87 = arith.select %85, %86, %83 : vector<4x16x96xi1>, vector<4x16x96xf32>
    %88 = arith.truncf %87 : vector<4x16x96xf32> to vector<4x16x96xbf16>
    %89 = arith.truncf %82 : vector<4x16x96xf32> to vector<4x16x96xbf16>
    %c15_i32_33 = arith.constant 15 : i32
    %90 = tpu.dynamic_rotate %82 by %c15_i32_33 dim 1 : vector<4x16x96xf32>, i32 -> vector<4x16x96xf32>
    %cst_34 = arith.constant 0.000000e+00 : f32
    %91 = vector.shape_cast %5 : vector<1x16x1xi1> to vector<1x16x1xi1>
    %92 = vector.broadcast %91 : vector<1x16x1xi1> to vector<4x16x96xi1>
    %93 = vector.broadcast %cst_34 : f32 to vector<4x16x96xf32>
    %94 = arith.select %92, %93, %90 : vector<4x16x96xi1>, vector<4x16x96xf32>
    %95 = arith.truncf %94 : vector<4x16x96xf32> to vector<4x16x96xbf16>
    %96 = tpu.concatenate %88, %89, %95 in 2 : vector<4x16x96xbf16>, vector<4x16x96xbf16>, vector<4x16x96xbf16> -> vector<4x16x288xbf16>
    %c0_35 = arith.constant 0 : index
    %c0_36 = arith.constant 0 : index
    %97 = vector.load %arg8[%c0_35, %c0_36] : memref<288x96xbf16, #tpu.memory_space<vmem>>, vector<288x96xbf16>
    %98 = vector.shape_cast %96 : vector<4x16x288xbf16> to vector<64x288xbf16>
    %cst_37 = arith.constant dense<0.000000e+00> : vector<64x96xf32>
    %99 = tpu.matmul %98, %97, %cst_37 {dimension_numbers = #tpu.dot_dimension_numbers<[1], [0], [0], [1], [0, 0, 1, 1], [], []>} : vector<64x288xbf16>, vector<288x96xbf16>, vector<64x96xf32> -> vector<64x96xf32>
    %100 = vector.shape_cast %99 : vector<64x96xf32> to vector<4x16x96xf32>
    %c0_38 = arith.constant 0 : index
    %c0_39 = arith.constant 0 : index
    %101 = vector.load %arg9[%c0_38, %c0_39] : memref<1x96xf32, #tpu.memory_space<vmem>>, vector<1x96xf32>
    %102 = vector.shape_cast %101 : vector<1x96xf32> to vector<1x1x96xf32>
    %103 = vector.broadcast %102 : vector<1x1x96xf32> to vector<4x16x96xf32>
    %104 = arith.addf %100, %103 : vector<4x16x96xf32>
    %cst_40 = arith.constant 0.000000e+00 : f32
    %105 = vector.broadcast %cst_40 : f32 to vector<4x16x96xf32>
    %106 = arith.maximumf %104, %105 : vector<4x16x96xf32>
    %107 = tpu.concatenate %106, %32 in 2 : vector<4x16x96xf32>, vector<4x16x32xf32> -> vector<4x16x128xf32>
    %c0_41 = arith.constant 0 : index
    %c0_42 = arith.constant 0 : index
    %c128 = arith.constant 128 : index
    %108 = vector.load %arg10[%c0_41, %c0_42, %c128] : memref<4x16x256xf32, #tpu.memory_space<vmem>>, vector<4x16x128xf32>
    tpu.vector_store %arg10[%c0_41, %c0_42, %c128], %107 {strides = array<i32>} : memref<4x16x256xf32, #tpu.memory_space<vmem>>, vector<4x16x128xf32>,
    return
  }
  func.func @transform_0(%arg0: i32) -> (i32, i32, i32) {
    %c0_i32 = arith.constant 0 : i32
    %c0_i32_0 = arith.constant 0 : i32
    %c0_i32_1 = arith.constant 0 : i32
    return %arg0, %c0_i32, %c0_i32_0 : i32, i32, i32
  }
  func.func @transform_1(%arg0: i32) -> (i32, i32) {
    %c0_i32 = arith.constant 0 : i32
    %c0_i32_0 = arith.constant 0 : i32
    %c0_i32_1 = arith.constant 0 : i32
    return %c0_i32, %c0_i32_0 : i32, i32
  }
  func.func @transform_2(%arg0: i32) -> (i32, i32) {
    %c0_i32 = arith.constant 0 : i32
    %c0_i32_0 = arith.constant 0 : i32
    %c0_i32_1 = arith.constant 0 : i32
    return %c0_i32, %c0_i32_0 : i32, i32
  }
  func.func @transform_3(%arg0: i32) -> (i32, i32) {
    %c0_i32 = arith.constant 0 : i32
    %c0_i32_0 = arith.constant 0 : i32
    %c0_i32_1 = arith.constant 0 : i32
    return %c0_i32, %c0_i32_0 : i32, i32
  }
  func.func @transform_4(%arg0: i32) -> (i32, i32) {
    %c0_i32 = arith.constant 0 : i32
    %c0_i32_0 = arith.constant 0 : i32
    %c0_i32_1 = arith.constant 0 : i32
    return %c0_i32, %c0_i32_0 : i32, i32
  }
  func.func @transform_5(%arg0: i32) -> (i32, i32) {
    %c0_i32 = arith.constant 0 : i32
    %c0_i32_0 = arith.constant 0 : i32
    %c0_i32_1 = arith.constant 0 : i32
    return %c0_i32, %c0_i32_0 : i32, i32
  }
  func.func @transform_6(%arg0: i32) -> (i32, i32) {
    %c0_i32 = arith.constant 0 : i32
    %c0_i32_0 = arith.constant 0 : i32
    %c0_i32_1 = arith.constant 0 : i32
    return %c0_i32, %c0_i32_0 : i32, i32
  }
  func.func @transform_7(%arg0: i32) -> (i32, i32) {
    %c0_i32 = arith.constant 0 : i32
    %c0_i32_0 = arith.constant 0 : i32
    %c0_i32_1 = arith.constant 0 : i32
    return %c0_i32, %c0_i32_0 : i32, i32
  }
  func.func @transform_8(%arg0: i32) -> (i32, i32) {
    %c0_i32 = arith.constant 0 : i32
    %c0_i32_0 = arith.constant 0 : i32
    %c0_i32_1 = arith.constant 0 : i32
    return %c0_i32, %c0_i32_0 : i32, i32
  }
  func.func @transform_9(%arg0: i32) -> (i32, i32, i32) {
    %c0_i32 = arith.constant 0 : i32
    %c0_i32_0 = arith.constant 0 : i32
    %c0_i32_1 = arith.constant 0 : i32
    return %arg0, %c0_i32, %c0_i32_0 : i32, i32, i32
  }
}

</mosaic_0001>

<bundles_post_ra>
// kernel: tpu_custom_call.1
= control target key start
LH: loop header
LB: loop body
LE: loop exit
PB: predicated region body
PF: predicated region fallthrough
CT: control target
= control target key end

     0   :  { %s3406_s0 = inlined_call_operand.hbm [shape: f32[16,16,32], index: 0, kind: input, shape index: {}]   ;;  %s3407_s1 = inlined_call_operand.hbm [shape: bf16[64,208], index: 1, kind: input, shape index: {}]   ;;  %s3408_s2 = inlined_call_operand.vmem [shape: f32[1,208], index: 2, kind: input, shape index: {}]   ;;  %s3409_s3 = inlined_call_operand.vmem [shape: bf16[144,64], index: 3, kind: input, shape index: {}]   ;;  %s3410_s4 = inlined_call_operand.vmem [shape: f32[1,64], index: 4, kind: input, shape index: {}]   ;;  %s3411_s5 = inlined_call_operand.hbm [shape: bf16[192,96], index: 5, kind: input, shape index: {}]   ;;  %s3412_s6 = inlined_call_operand.vmem [shape: f32[1,96], index: 6, kind: input, shape index: {}]   ;;  %s3413_s7 = inlined_call_operand.vmem [shape: bf16[288,96], index: 7, kind: input, shape index: {}]   ;;  %s3414_s8 = inlined_call_operand.vmem [shape: f32[1,96], index: 8, kind: input, shape index: {}]   ;;  %s3415_s9 = inlined_call_operand.hbm [shape: f32[16,16,256], index: 9, kind: output, shape index: {}]  }
   0x1   :  { %3422 = sst [smem:[#allocation13_spill]] %s3407_s1 }
   0x2   :  { %3423 = sst [smem:[#allocation14_spill]] %s3411_s5 }
   0x3   :  { %14 = vsyncpa [#allocation3], 0 }
   0x4   :  { %16 = vsyncpa [#allocation3 + $0x1], 0 }
   0x5   :  { %17 = vsyncpa [#allocation6], 0 }
   0x6   :  { %18 = vsyncpa [#allocation4], 0 }
   0x7   :  { %20 = vsyncpa [#allocation4 + $0x1], 0  ;;  %s2516_s30 = smov 0   ;;  %s2518_s10 = smov 0  }
   0x8   :  { %s2520_s11 = smov 0   ;;  %s2522_s12 = smov 0  }
   0x9 LB: > { %s2537_s13 = sadd.s32 4294967295, %s2447_s12   ;;  %s1956_s14 = sadd.s32 4294967294, %s2447_s12   ;;  %s2447_s12 = sphi %s2522_s12, %s3445_s12   ;;  %s2443_s11 = sphi %s2520_s11, %s3444_s11   ;;  %s2439_s10 = sphi %s2518_s10, %s3443_s10   ;;  %s2435_s30 = sphi %s2516_s30, %s3442_s30  }
   0xa   : > { %p46_p0 = scmp.ne.s32.totalorder %s2439_s10, %s2435_s30  ;;  %p3418_p1 = scmp.eq.s32.totalorder %s2537_s13, 0 }
   0xb   : > { %p238_p2 = scmp.eq.s32.totalorder %s2537_s13, 3  ;;  %p244_p3 = scmp.eq.s32.totalorder %s1956_s14, 3 }
   0xc   : > { %p2546_p4 = por %p3418_p1, %p46_p0  ;;  %p1957_p5 = scmp.ge.s32.totalorder %s2447_s12, 1 }
   0xd   : > { %p2551_p6 = por %p244_p3, %p46_p0  ;;  %p251_p7 = scmp.lt.s32.totalorder %s2447_s12, 5 }
   0xe   : > { %s3424_s15 = scalar_select %p2546_p4, 1, 0 }
   0xf   : > { %s3425_s16 = scalar_select %p2551_p6, 1, 0 }
  0x10   : > { %p2556_p8 = pnand %p1957_p5, %p251_p7  ;;  %s2449_s18 = smov [#allocation5]  }
  0x11   : > { %s263_s19 = sshll.u32 %s2449_s18, 4  ;;  %s2450_s21 = smov [#allocation7]   ;;  %s264_s19 = int_to_ptr.vmem [resolvable:$true] %s263_s19 }
  0x12   : > { %s3426_s17 = scalar_select %p2556_p8, 1, 0 }
  0x13   : > { %p2120_p9 = pneg %p2556_p8  ;;  %s285_s22 = sshll.u32 %s2450_s21, 4  ;;  %s286_s22 = int_to_ptr.vmem [resolvable:$true] %s285_s22 }
  0x14   : > { %s2310_s23 = scalar_lea.vmem %s264_s19, 1024  ;;  %p2318_p3 = scmp.lt.s32.totalorder %s264_s19, %s264_s19 }
  0x15   : > { %p2564_p10 = pnand %p2120_p9, %p3418_p1  ;;  %p2311_p12 = scmp.ne.s32.totalorder %s264_s19, %s2310_s23 }
  0x16   : > { %p2319_p5 = scmp.lt.s32.totalorder %s2310_s23, %s2310_s23 }
  0x17   : > { %p2301_p11 = pneg %p2564_p10 }
  0x18   : > { %p2320_p7 = por %p2319_p5, %p2318_p3 }
  0x19   : > { %p2313_p13 = pnand %p2311_p12, %p2301_p11 }
  0x1b   : > { %p2314_p0 = pneg %p2313_p13 }
  0x1d   : > { %p2321_p9 = pnand %p2320_p7, %p2314_p0 }
  0x1f   : > { %2324 = shalt.err (!%p2321_p9)
}
  0x20   : > { %s3416_s24 = smov 128   ;;  %s3417_s25 = smov 8  }
  0x21   : > { %s3428_s1 = sld [smem:[#allocation13_spill]]  ;;  %s2336_s28 = scalar_lea.vmem %s286_s22, 1536 }
  0x22   : > { %p2337_p12 = scmp.ne.s32.totalorder %s286_s22, %s2336_s28  ;;  %p2344_p0 = scmp.lt.s32.totalorder %s286_s22, %s286_s22 }
  0x23   : > { %p2345_p5 = scmp.lt.s32.totalorder %s2336_s28, %s2336_s28 }
  0x24   : > { %p2339_p13 = pnand %p2337_p12, %p2301_p11 }
  0x25   : > { %p2346_p7 = por %p2345_p5, %p2344_p0 }
  0x26   : > { %p2340_p3 = pneg %p2339_p13 }
  0x27   : > { %2123 = dma.hbm_to_vmem [thread:$0]  (!%p2564_p10), %s3428_s1, 1024, %s264_s19, [#allocation6], %s3416_s24, %s3416_s24, %s3417_s25  }
  0x28   : > { %p2347_p9 = pnand %p2346_p7, %p2340_p3 }
  0x2a   : > { %2350 = shalt.err (!%p2347_p9)
}
  0x2b   : > { %s2453_s29 = smov 64   ;;  %s2454_s14 = smov 4  }
  0x2c   : > { %s3429_s5 = sld [smem:[#allocation14_spill]]  ;;  %s2590_s21 = sadd.s32 1, %s2447_s12  }
  0x2d   : > { %s30_s23 = ssub.s32 %s2447_s12, %s2590_s21  ;;  %s33_s26 = sadd.s32 1, %s2443_s11 }
  0x2e   : > { %p31_p11 = scmp.eq.s32.totalorder %s30_s23, 0  ;;  %p40_p12 = scmp.ne.s32.totalorder %s2443_s11, %s2439_s10 }
  0x2f   : > { %p41_p13 = scmp.eq.s32.totalorder %s2447_s12, 0  ;;  %p2137_p5 = scmp.lt.s32.totalorder %s2447_s12, 4 }
  0x30   : > { %s2599_s27 = scalar_select %p31_p11, %s2443_s11, %s33_s26  }
  0x31   : > { %p42_p3 = por %p41_p13, %p40_p12  ;;  %p2603_p0 = por %p238_p2, %p40_p12 }
  0x32   : > { %2126 = dma.hbm_to_vmem [thread:$0]  (!%p2564_p10), %s3429_s5, 1536, %s286_s22, [#allocation6], %s2453_s29, %s2453_s29, %s2454_s14  }
  0x33   : > { %3430 = sst [smem:[#allocation12_spill]] %s2599_s27  ;;  %s308_s20 = sand.u32 1, %s2443_s11  }
  0x34   : > { %s3431_s28 = scalar_select %p2603_p0, 1, 0 }
  0x35   : > { %s1961_s18 = sshll.u32 %s308_s20, 6  ;;  %s2043_s22 = sshll.u32 %s2447_s12, 10 }
  0x36   : > { %s2613_s19 = scalar_lea.hbm %s3406_s0, %s2043_s22  ;;  %s312_s23 = scalar_lea.vmem [#allocation2], %s1961_s18 }
  0x37   : > { %s320_s26 = sshll.u32 %s312_s23, 4  ;;  %p2617_p2 = pnand %p2137_p5, %p42_p3  ;;  %s2615_s26 = int_to_ptr.vmem [resolvable:$true] %s320_s26 }
  0x38   : > { %s2621_s25 = scalar_lea.sflag [#allocation3], %s308_s20  ;;  %s2351_s1 = scalar_lea.hbm %s2613_s19, 1024 }
  0x39   : > { %p2352_p10 = scmp.ne.s32.totalorder %s2613_s19, %s2351_s1  ;;  %p2353_p7 = pneg %p2617_p2 }
  0x3a   : > { %s2356_s18 = scalar_lea.hbm %s3406_s0, 4096  ;;  %p2357_p12 = scmp.lt.s32.totalorder %s2613_s19, %s3406_s0 }
  0x3b   : > { %p2354_p9 = pnand %p2353_p7, %p2352_p10  ;;  %p2358_p13 = scmp.lt.s32.totalorder %s2356_s18, %s2351_s1 }
  0x3d   : > { %p2355_p11 = pneg %p2354_p9  ;;  %p2359_p3 = por %p2358_p13, %p2357_p12 }
  0x3f   : > { %p2360_p5 = pnand %p2359_p3, %p2355_p11 }
  0x41   : > { %2363 = shalt.err (!%p2360_p5)
}
  0x42   : > { %s2364_s20 = scalar_lea.vmem %s2615_s26, 1024  ;;  %s2455_s5 = smov [#allocation2]  }
  0x43   : > { %p2365_p1 = scmp.ne.s32.totalorder %s2615_s26, %s2364_s20  ;;  %s2369_s27 = sshll.u32 %s2455_s5, 4  ;;  %s2370_s27 = int_to_ptr.vmem [resolvable:$false] %s2369_s27 }
  0x44   : > { %s2371_s22 = scalar_lea.vmem %s2370_s27, 2048  ;;  %p2372_p9 = scmp.lt.s32.totalorder %s2615_s26, %s2370_s27 }
  0x45   : > { %p2367_p6 = pnand %p2365_p1, %p2353_p7  ;;  %p2373_p0 = scmp.lt.s32.totalorder %s2371_s22, %s2364_s20 }
  0x47   : > { %p2368_p10 = pneg %p2367_p6  ;;  %p2374_p4 = por %p2373_p0, %p2372_p9 }
  0x49   : > { %p2375_p8 = pnand %p2374_p4, %p2368_p10 }
  0x4b   : > { %2378 = shalt.err (!%p2375_p8)
}
  0x4c   : > { %s3433_s1 = smov 8   ;;  %s3434_s29 = smov 128  }
  0x4d   : > { %2130 = dma.hbm_to_vmem [thread:$0]  (!%p2617_p2), %s2613_s19, 1024, %s2615_s26, %s2621_s25, %s3434_s29, %s3434_s29, %s3433_s1  }
  0x4e   : > { %p3435_p1 = scmp.ne.s32.totalorder %s3426_s17, 0 }
  0x4f   : > { %s2648_s5 = sand.u32 (!%p3435_p1), 1, %s2439_s10   ;;  %p3436_p4 = scmp.ne.s32.totalorder (!%p3435_p1), %s3424_s15, 0 }
  0x50   : > { %332 = sbr.rel (%p3435_p1) target bundleno = 1126 (0x466), region = 56  ;;  %s1966_s27 = sshll.u32 (!%p3435_p1), %s2648_s5, 6 }
  0x51   : > { %s335_s18 = scalar_lea.sflag (!%p3435_p1), [#allocation3], %s2648_s5  ;;  %s2652_s14 = scalar_lea.vmem (!%p3435_p1), [#allocation2], %s1966_s27 }
  0x55   : > { %2422 = dma.done.wait (%p3436_p4), %s335_s18, 1024  }
  0x56   : > { %2424 = vsyncadd (%p3436_p4), %s335_s18, 4294966272  ;;  %p3437_p6 = scmp.eq.s32.totalorder %s2537_s13, 0 }
  0x58   : > { %2426 = dma.done.wait (%p3437_p6), [#allocation6], 2560   ;;  %p3438_p8 = pmov %p3437_p6 }
  0x59   : > { %v392_v0 = vlaneseq  ;;  %v2456_v3 = vmov 0   ;;  %v2671_v4 = vld [vmem:[%s2652_s14] sm:$0xff]  ;;  %v2674_v5 = vld [vmem:[%s2652_s14 + $0x8] sm:$0xff]  ;;  %v2680_v6 = vld [vmem:[%s2652_s14 + $0x10] sm:$0xff]  ;;  %s2457_s15 = smov 32   ;;  %vm493_vm4 = vcmask 261120  }
  0x5a   : > { %2428 = vsyncadd (%p3438_p8), [#allocation6], 4294964736  ;;  %595 = vmatprep.mubr.bf16.mxu0 %v2456_v3  ;;  %903 = vmatprep.subr.bf16.mxu1 %v2456_v3  ;;  %v399_v7 = vrot.slane %v2671_v4, 7  ;;  %v403_v8 = vrot.slane %v2674_v5, 7  ;;  %v428_v9 = vrot.slane %v2671_v4, 1  ;;  %v432_v10 = vrot.slane %v2674_v5, 1 }
  0x5b   : > { %v2662_v1 = vshrl.u32 %v392_v0, 7  ;;  %v2687_v11 = vld [vmem:[%s2652_s14 + $0x18] sm:$0xff]  ;;  %v400_v12 = vrot.slane %v2680_v6, 7  ;;  %v429_v14 = vrot.slane %v2680_v6, 1  ;;  %v2694_v16 = vld [vmem:[%s2652_s14 + $0x20] sm:$0xff]  ;;  %v2705_v21 = vld [vmem:[%s2652_s14 + $0x28] sm:$0xff] }
  0x5c   : > { %v404_v13 = vrot.slane %v2687_v11, 7  ;;  %v433_v15 = vrot.slane %v2687_v11, 1  ;;  %v2248_v26 = vld [vmem:[#allocation5 + $0x34] ss:$8 sps:$4 sm:$0xff]   ;;  %v2250_v27 = vld [vmem:[#allocation5 + $0x30] ss:$8 sps:$4 sm:$0xff]  }
  0x5d   : > { %v2665_v2 = vadd.s32 8, %v2662_v1  ;;  %vm395_vm0 = vcmp.eq.s32.totalorder %v2662_v1, 0  ;;  %vm407_vm2 = vcmp.lt.s32.totalorder %v2662_v1, 1  ;;  %vm436_vm3 = vcmp.lt.s32.totalorder %v2662_v1, 7  ;;  %v2724_v32 = vld [vmem:[%s2652_s14 + $0x30] sm:$0xff]  ;;  %571 = vmatprep.subr.bf16.mxu0 %v2248_v26  ;;  %v2739_v46 = vld [vmem:[%s2652_s14 + $0x38] sm:$0xff] }
  0x5e   : > { %v408_v17 = vsel %vm407_vm2, %v399_v7, %v403_v8  ;;  %v412_v18 = vsel %vm407_vm2, %v403_v8, %v399_v7  ;;  %v437_v19 = vsel %vm436_vm3, %v428_v9, %v432_v10  ;;  %v441_v20 = vsel %vm436_vm3, %v432_v10, %v428_v9  ;;  %v2251_v33 = vld [vmem:[#allocation5 + $0x24] ss:$8 sps:$4 sm:$0xff]   ;;  %572 = vmatpush1.bf16.msra.mxu0 %v2250_v27  ;;  %v2253_v42 = vld [vmem:[#allocation5 + $0x20] ss:$8 sps:$4 sm:$0xff]   ;;  %v2254_v48 = vld [vmem:[#allocation5 + $0x14] ss:$8 sps:$4 sm:$0xff]  }
  0x5f   : > { %vm398_vm1 = vcmp.eq.s32.totalorder %v2665_v2, 15  ;;  %v420_v22 = vsel %vm395_vm0, %v2671_v4, %v412_v18  ;;  %v458_v24 = vmax.f32 %v2674_v5, %v408_v17  ;;  %v409_v25 = vsel %vm407_vm2, %v400_v12, %v404_v13  ;;  %573 = vmatprep.subr.bf16.mxu0 %v2251_v33  ;;  %v2256_v53 = vld [vmem:[#allocation5 + $0x10] ss:$8 sps:$4 sm:$0xff]   ;;  %v2257_v58 = vld [vmem:[#allocation5 + $0x4] ss:$8 sps:$4 sm:$0xff]   ;;  %s2458_s25 = smov 16  }
  0x60   : > { %v450_v23 = vsel %vm398_vm1, %v2674_v5, %v441_v20  ;;  %v457_v28 = vmax.f32 %v2671_v4, %v420_v22  ;;  %v413_v29 = vsel %vm407_vm2, %v404_v13, %v400_v12  ;;  %v438_v30 = vsel %vm436_vm3, %v429_v14, %v433_v15  ;;  %v2259_v13 = vld [vmem:[#allocation5] ss:$8 sps:$4 sm:$0xff]   ;;  %s2459_s19 = smov 80   ;;  %s2460_s26 = smov 64  }
  0x61   : > { %v442_v31 = vsel %vm436_vm3, %v433_v15, %v429_v14  ;;  %v466_v34 = vmax.f32 %v458_v24, %v450_v23  ;;  %v422_v35 = vsel %vm395_vm0, %v2680_v6, %v413_v29  ;;  %v460_v37 = vmax.f32 %v2687_v11, %v409_v25  ;;  %v2262_v33 = vld [vmem:[#allocation7 + $0x28] sm:$0xff]   ;;  %s2461_s23 = smov 112   ;;  %s2462_s14 = smov 96  }
  0x62   : > { %v452_v36 = vsel %vm398_vm1, %v2687_v11, %v442_v31  ;;  %v465_v38 = vmax.f32 %v457_v28, %v437_v19  ;;  %v459_v39 = vmax.f32 %v2680_v6, %v422_v35  ;;  %v401_v40 = vrot.slane %v2694_v16, 7  ;;  %574 = vmatpush1.bf16.msra.mxu0 %v2253_v42  ;;  %v2260_v31 = vld [vmem:[#allocation7 + $0x38] sm:$0xff]   ;;  %s1969_s1 = sshll.u32 %s2648_s5, 7  ;;  %s2045_s18 = sshll.u32 %s2537_s13, 11 }
  0x63   : > { %v405_v41 = vrot.slane %v2705_v21, 7  ;;  %v468_v43 = vmax.f32 %v460_v37, %v452_v36  ;;  %v430_v44 = vrot.slane %v2694_v16, 1  ;;  %v434_v45 = vrot.slane %v2705_v21, 1  ;;  %575 = vmatprep.subr.bf16.mxu0 %v2254_v48  ;;  %v2264_v35 = vld [vmem:[#allocation7 + $0x18] sm:$0xff]   ;;  %v2265_v36 = vld [vmem:[#allocation7 + $0x10] sm:$0xff]   ;;  %v2266_v37 = vld [vmem:[#allocation7 + $0x8] sm:$0xff]  }
  0x64   : > { %v402_v47 = vrot.slane %v2724_v32, 7  ;;  %v477_v49 = vpack.c.bf16 %v466_v34, %v465_v38  ;;  %v467_v50 = vmax.f32 %v459_v39, %v438_v30  ;;  %v406_v62 = vrot.slane %v2739_v46, 7  ;;  %v2263_v34 = vld [vmem:[#allocation7 + $0x20] sm:$0xff]   ;;  %v2268_v39 = vld [vmem:[#allocation7 + $0x58] sm:$0xff]   ;;  %v2270_v48 = vld [vmem:[#allocation7 + $0x48] sm:$0xff]   ;;  %s1850_s13 = scalar_lea.sflag [#allocation4], %s2648_s5 }
  0x65   : > { %v410_v51 = vsel %vm407_vm2, %v401_v40, %v405_v41  ;;  %v414_v52 = vsel %vm407_vm2, %v405_v41, %v401_v40  ;;  %v439_v55 = vsel %vm436_vm3, %v430_v44, %v434_v45  ;;  %v443_v56 = vsel %vm436_vm3, %v434_v45, %v430_v44  ;;  %v2267_v38 = vld [vmem:[#allocation7] sm:$0xff]   ;;  %v2269_v44 = vld [vmem:[#allocation7 + $0x50] sm:$0xff]   ;;  %p3439_p2 = scmp.ne.s32.totalorder %s3431_s28, 0 }
  0x66   : > { %v424_v54 = vsel %vm395_vm0, %v2694_v16, %v414_v52  ;;  %v462_v57 = vmax.f32 %v2705_v21, %v410_v51  ;;  %485 = vrot.lane.b32.xlu0 %v477_v49, %s2457_s15  ;;  %v478_v59 = vpack.c.bf16 %v468_v43, %v467_v50  ;;  %v454_v60 = vsel %vm398_vm1, %v2705_v21, %v443_v56  ;;  %v636_v41 = vld [vmem:[%s3408_s2] sm:$0x3] }
  0x67   : > { %v461_v61 = vmax.f32 %v2694_v16, %v424_v54  ;;  %v431_v0 = vrot.slane %v2724_v32, 1  ;;  %v435_v7 = vrot.slane %v2739_v46, 1  ;;  %v473_v8 = vpack.c.bf16 %v2674_v5, %v2671_v4  ;;  %576 = vmatpush1.bf16.msra.mxu0 %v2256_v53 }
  0x68   : > { %v470_v63 = vmax.f32 %v462_v57, %v454_v60  ;;  %v411_v10 = vsel %vm407_vm2, %v402_v47, %v406_v62  ;;  %v415_v12 = vsel %vm407_vm2, %v406_v62, %v402_v47  ;;  %v474_v14 = vpack.c.bf16 %v2687_v11, %v2680_v6  ;;  %577 = vmatprep.subr.bf16.mxu0 %v2257_v58 }
  0x69   : > { %v469_v9 = vmax.f32 %v461_v61, %v439_v55  ;;  %v426_v15 = vsel %vm395_vm0, %v2724_v32, %v415_v12  ;;  %v440_v17 = vsel %vm436_vm3, %v431_v0, %v435_v7  ;;  %v444_v4 = vsel %vm436_vm3, %v435_v7, %v431_v0  ;;  %v2271_v55 = vld [vmem:[#allocation7 + $0x40] sm:$0xff]  }
  0x6a   : > { %v464_v5 = vmax.f32 %v2739_v46, %v411_v10  ;;  %487 = vrot.lane.b32.xlu0 %v478_v59, %s2457_s15  ;;  %v456_v19 = vsel %vm398_vm1, %v2739_v46, %v444_v4  ;;  %v463_v6 = vmax.f32 %v2724_v32, %v426_v15  ;;  %v475_v20 = vpack.c.bf16 %v2705_v21, %v2694_v16 }
  0x6b   : > { %v479_v18 = vpack.c.bf16 %v470_v63, %v469_v9  ;;  %v476_v22 = vpack.c.bf16 %v2739_v46, %v2724_v32  ;;  %578 = vmatpush1.bf16.msra.mxu0 %v2259_v13  ;;  %vm554_vm5 = vcmask 523264   ;;  %v2261_v32 = vld [vmem:[#allocation7 + $0x30] sm:$0xff]   ;;  %v640_v40 = vsub.s32 0, %v2662_v1 }
  0x6c   : > { %v472_v11 = vmax.f32 %v464_v5, %v456_v19  ;;  %v471_v23 = vmax.f32 %v463_v6, %v440_v17  ;;  %1304 = vmatprep.subr.bf16.mxu0 %v2456_v3  ;;  %v644_v42 = vsub.s32 1, %v2662_v1  ;;  %vm894_vm6 = vcmask 130048  }
  0x6d   : > { %489 = vrot.lane.b32.xlu1 %v479_v18, %s2457_s15  ;;  %v2815_v43 = vrot.slane %v636_v41, %v640_v40  ;;  %vm1175_vm7 = vcmask 654336   ;;  %vm796_vm8 = vcmask 392192   ;;  %vm809_vm9 = vcmask 785408  }
  0x6e   : > { %v480_v24 = vpack.c.bf16 %v472_v11, %v471_v23  ;;  %v2817_v45 = vrot.slane %v636_v41, %v644_v42 }
  0x71   : > { %491 = vrot.lane.b32.xlu1 %v480_v24, %s2457_s15 }
  0xd8   : > { %v486_v25 = vpop.permute.xlu0 %485 }
  0xd9   : > { %v496_v26 = vsel %vm493_vm4, %v473_v8, %v486_v25 }
  0xda   : > { %1978 = vmatmul.mubr.msk.bf16.vlgmr.msra.gmra.mxu0 %vm554_vm5, %v496_v26 }
  0xdb   : > { %605 = vmatprep.mubr.bf16.mxu0 %v2456_v3  ;;  %1305 = vmatpush1.bf16.msra.mxu0 %v2260_v31 }
  0xdc   : > { %v488_v16 = vpop.permute.xlu0 %487  ;;  %1306 = vmatprep.subr.bf16.mxu0 %v2456_v3 }
  0xdd   : > { %v499_v21 = vsel %vm493_vm4, %v474_v14, %v488_v16 }
  0xdf   : > { %v490_v27 = vpop.permute.xlu1 %489  ;;  %1307 = vmatpush1.bf16.msra.mxu0 %v2261_v32 }
  0xe0   : > { %v502_v28 = vsel %vm493_vm4, %v475_v20, %v490_v27  ;;  %1308 = vmatprep.subr.bf16.mxu0 %v2456_v3 }
  0xe2   : > { %1979 = vmatmul.mubr.msk.bf16.gmra.mxu0 %vm554_vm5, %v499_v21 }
  0xe3   : > { %615 = vmatprep.mubr.bf16.mxu0 %v2456_v3  ;;  %v492_v29 = vpop.permute.xlu1 %491  ;;  %1309 = vmatpush1.bf16.msra.mxu0 %v2262_v33 }
  0xe4   : > { %v505_v30 = vsel %vm493_vm4, %v476_v22, %v492_v29  ;;  %1310 = vmatprep.subr.bf16.mxu0 %v2456_v3 }
  0xe7   : > { %1311 = vmatpush1.bf16.msra.mxu0 %v2263_v34 }
  0xe8   : > { %1312 = vmatprep.subr.bf16.mxu0 %v2456_v3 }
  0xea   : > { %1980 = vmatmul.mubr.msk.bf16.gmra.mxu0 %vm554_vm5, %v502_v28 }
  0xeb   : > { %625 = vmatprep.mubr.bf16.mxu0 %v2456_v3  ;;  %1313 = vmatpush1.bf16.msra.mxu0 %v2264_v35 }
  0xec   : > { %1314 = vmatprep.subr.bf16.mxu0 %v2456_v3 }
  0xef   : > { %1315 = vmatpush1.bf16.msra.mxu0 %v2265_v36 }
  0xf0   : > { %1316 = vmatprep.subr.bf16.mxu0 %v2456_v3 }
  0xf2   : > { %1981 = vmatmul.mubr.msk.bf16.gmra.mxu0 %vm554_vm5, %v505_v30 }
  0xf3   : > { %1317 = vmatpush1.bf16.msra.mxu0 %v2266_v37 }
  0xf4   : > { %1318 = vmatprep.subr.bf16.mxu0 %v2456_v3 }
  0xf7   : > { %1319 = vmatpush1.bf16.msra.mxu0 %v2267_v38 }
  0xf8   : > { %1328 = vmatprep.subr.bf16.mxu0 %v2456_v3 }
  0xfb   : > { %1329 = vmatpush2.bf16.msra.mxu0 %v2268_v39 }
  0xfc   : > { %1330 = vmatprep.subr.bf16.mxu0 %v2456_v3 }
  0xff   : > { %1331 = vmatpush2.bf16.msra.mxu0 %v2269_v44 }
 0x100   : > { %1332 = vmatprep.subr.bf16.mxu0 %v2456_v3 }
 0x103   : > { %1333 = vmatpush2.bf16.msra.mxu0 %v2270_v48 }
 0x104   : > { %1334 = vmatprep.subr.bf16.mxu0 %v2456_v3 }
 0x107   : > { %1335 = vmatpush2.bf16.msra.mxu0 %v2271_v55 }
 0x19a   : > { %v597_v46 = vpop.f32.mrf.mxu0 }
 0x19b   : > { %v648_v47 = vadd.f32 %v2815_v43, %v597_v46 }
 0x19c   : > { %v599_v49 = vpop.f32.mrf.mxu0 }
 0x19d   : > { %v649_v50 = vadd.f32 %v2817_v45, %v599_v49  ;;  %v2823_v52 = vmax.f32 %v648_v47, 0.0 }
 0x19e   : > { %v601_v51 = vpop.f32.mrf.mxu0 }
 0x19f   : > { %v2825_v53 = vmax.f32 %v649_v50, 0.0  ;;  %v650_v54 = vadd.f32 %v2815_v43, %v601_v51 }
 0x1a0   : > { %v603_v56 = vpop.f32.mrf.mxu0 }
 0x1a1   : > { %v2828_v57 = vmax.f32 %v650_v54, 0.0  ;;  %v651_v58 = vadd.f32 %v2817_v45, %v603_v56  ;;  %v2188_v59 = vpack.i.bf16 %v2825_v53, %v2823_v52 }
 0x1a2   : > { %v607_v60 = vpop.f32.mrf.mxu0 }
 0x1a3   : > { %v2833_v61 = vmax.f32 %v651_v58, 0.0  ;;  %v652_v62 = vadd.f32 %v2815_v43, %v607_v60  ;;  %2189 = vrot.lane.b32.xlu0 %v2188_v59, %s2458_s25  ;;  %v2840_v7 = vpack.c.bf16 %v2828_v57, %v2823_v52  ;;  %v2272_v58 = vld [vmem:[%s3409_s3 + $0x38] sm:$0xff]   ;;  %v2273_v59 = vld [vmem:[%s3409_s3 + $0x30] sm:$0xff]   ;;  %v2274_v60 = vld [vmem:[%s3409_s3 + $0x28] sm:$0xff]  }
 0x1a4   : > { %v609_v63 = vpop.f32.mrf.mxu0  ;;  %904 = vmatpush1.bf16.msra.mxu1 %v2272_v58 }
 0x1a5   : > { %v653_v0 = vadd.f32 %v2817_v45, %v609_v63  ;;  %v2193_v8 = vpack.i.bf16 %v2833_v61, %v2828_v57  ;;  %v2844_v10 = vmax.f32 %v652_v62, 0.0  ;;  %v1123_v4 = vpack.c.bf16 %v2833_v61, %v2825_v53  ;;  %905 = vmatprep.subr.bf16.mxu1 %v2456_v3  ;;  %v2275_v62 = vld [vmem:[%s3409_s3 + $0x20] sm:$0xff]   ;;  %v2276_v63 = vld [vmem:[%s3409_s3 + $0x18] sm:$0xff]  }
 0x1a6   : > { %v611_v9 = vpop.f32.mrf.mxu0 }
 0x1a7   : > { %v2846_v12 = vmax.f32 %v653_v0, 0.0  ;;  %v654_v13 = vadd.f32 %v2815_v43, %v611_v9  ;;  %1159 = vrot.lane.b32.xlu0 %v2840_v7, %s2459_s19  ;;  %2194 = vrot.lane.b32.xlu1 %v2193_v8, %s2458_s25  ;;  %v2277_v0 = vld [vmem:[%s3409_s3 + $0x10] sm:$0xff]   ;;  %v2279_v8 = vld [vmem:[%s3409_s3] sm:$0xff]  }
 0x1a8   : > { %v613_v14 = vpop.f32.mrf.mxu0  ;;  %906 = vmatpush1.bf16.msra.mxu1 %v2273_v59  ;;  %v2280_v9 = vld [vmem:[%s3409_s3 + $0x40] sm:$0xff]  }
 0x1a9   : > { %v2852_v15 = vmax.f32 %v654_v13, 0.0  ;;  %v655_v17 = vadd.f32 %v2817_v45, %v613_v14  ;;  %v2198_v5 = vpack.i.bf16 %v2846_v12, %v2844_v10  ;;  %907 = vmatprep.subr.bf16.mxu1 %v2456_v3 }
 0x1aa   : > { %v617_v18 = vpop.f32.mrf.mxu0 }
 0x1ab   : > { %v2859_v19 = vmax.f32 %v655_v17, 0.0  ;;  %v656_v6 = vadd.f32 %v2815_v43, %v617_v18  ;;  %1161 = vrot.lane.b32.xlu1 %v1123_v4, %s2459_s19  ;;  %2199 = vrot.lane.b32.xlu0 %v2198_v5, %s2458_s25  ;;  %v741_v22 = vpack.c.bf16 %v2852_v15, %v2844_v10  ;;  %v2233_v55 = vpack.i.bf16 %v2852_v15, %v2844_v10 }
 0x1ac   : > { %v619_v11 = vpop.f32.mrf.mxu0  ;;  %908 = vmatpush1.bf16.msra.mxu1 %v2274_v60 }
 0x1ad   : > { %v657_v20 = vadd.f32 %v2817_v45, %v619_v11  ;;  %v2203_v23 = vpack.i.bf16 %v2859_v19, %v2852_v15  ;;  %v2869_v25 = vmax.f32 %v656_v6, 0.0  ;;  %v1124_v29 = vpack.c.bf16 %v2859_v19, %v2846_v12  ;;  %909 = vmatprep.subr.bf16.mxu1 %v2456_v3 }
 0x1ae   : > { %v621_v24 = vpop.f32.mrf.mxu0 }
 0x1af   : > { %v2871_v26 = vmax.f32 %v657_v20, 0.0  ;;  %v658_v16 = vadd.f32 %v2815_v43, %v621_v24  ;;  %1163 = vrot.lane.b32.xlu0 %v741_v22, %s2459_s19  ;;  %2204 = vrot.lane.b32.xlu1 %v2203_v23, %s2458_s25 }
 0x1b0   : > { %v623_v21 = vpop.f32.mrf.mxu0  ;;  %910 = vmatpush1.bf16.msra.mxu1 %v2275_v62 }
 0x1b1   : > { %v2876_v27 = vmax.f32 %v658_v16, 0.0  ;;  %v659_v28 = vadd.f32 %v2817_v45, %v623_v21  ;;  %v2208_v30 = vpack.i.bf16 %v2871_v26, %v2869_v25  ;;  %911 = vmatprep.subr.bf16.mxu1 %v2456_v3 }
 0x1b2   : > { %v627_v31 = vpop.f32.mrf.mxu0 }
 0x1b3   : > { %v2883_v32 = vmax.f32 %v659_v28, 0.0  ;;  %v660_v33 = vadd.f32 %v2815_v43, %v627_v31  ;;  %1165 = vrot.lane.b32.xlu1 %v1124_v29, %s2459_s19  ;;  %2209 = vrot.lane.b32.xlu0 %v2208_v30, %s2458_s25  ;;  %v742_v36 = vpack.c.bf16 %v2876_v27, %v2869_v25  ;;  %v2238_v54 = vpack.i.bf16 %v2876_v27, %v2869_v25 }
 0x1b4   : > { %v629_v34 = vpop.f32.mrf.mxu0  ;;  %912 = vmatpush1.bf16.msra.mxu1 %v2276_v63 }
 0x1b5   : > { %v661_v35 = vadd.f32 %v2817_v45, %v629_v34  ;;  %v2213_v37 = vpack.i.bf16 %v2883_v32, %v2876_v27  ;;  %v2893_v39 = vmax.f32 %v660_v33, 0.0  ;;  %v1125_v47 = vpack.c.bf16 %v2883_v32, %v2871_v26  ;;  %913 = vmatprep.subr.bf16.mxu1 %v2456_v3 }
 0x1b6   : > { %v631_v38 = vpop.f32.mrf.mxu0 }
 0x1b7   : > { %v2895_v40 = vmax.f32 %v661_v35, 0.0  ;;  %v662_v41 = vadd.f32 %v2815_v43, %v631_v38  ;;  %1167 = vrot.lane.b32.xlu0 %v742_v36, %s2459_s19  ;;  %2214 = vrot.lane.b32.xlu1 %v2213_v37, %s2458_s25 }
 0x1b8   : > { %v633_v42 = vpop.f32.mrf.mxu0  ;;  %914 = vmatpush1.bf16.msra.mxu1 %v2277_v0 }
 0x1b9   : > { %v2900_v44 = vmax.f32 %v662_v41, 0.0  ;;  %v663_v46 = vadd.f32 %v2817_v45, %v633_v42  ;;  %v2218_v48 = vpack.i.bf16 %v2895_v40, %v2893_v39  ;;  %v2228_v45 = vpack.i.bf16 %v2828_v57, %v2823_v52  ;;  %915 = vmatprep.subr.bf16.mxu1 %v2456_v3 }
 0x1bb   : > { %v2907_v49 = vmax.f32 %v663_v46, 0.0  ;;  %1169 = vrot.lane.b32.xlu1 %v1125_v47, %s2459_s19  ;;  %2219 = vrot.lane.b32.xlu0 %v2218_v48, %s2458_s25  ;;  %v743_v43 = vpack.c.bf16 %v2900_v44, %v2893_v39  ;;  %v2243_v56 = vpack.i.bf16 %v2900_v44, %v2893_v39 }
 0x1bd   : > { %v2223_v50 = vpack.i.bf16 %v2907_v49, %v2900_v44  ;;  %v1126_v51 = vpack.c.bf16 %v2907_v49, %v2895_v40 }
 0x1bf   : > { %1171 = vrot.lane.b32.xlu0 %v743_v43, %s2459_s19  ;;  %2224 = vrot.lane.b32.xlu1 %v2223_v50, %s2458_s25 }
 0x1c3   : > { %2229 = vrot.lane.b32.xlu0 %v2228_v45, %s2460_s26  ;;  %1173 = vrot.lane.b32.xlu1 %v1126_v51, %s2459_s19  ;;  %s3357_s19 = scalar_lea.hbm %s3415_s9, %s2045_s18 }
 0x1c7   : > { %2239 = vrot.lane.b32.xlu0 %v2238_v54, %s2460_s26  ;;  %2234 = vrot.lane.b32.xlu1 %v2233_v55, %s2460_s26 }
 0x1cb   : > { %776 = vrot.lane.b32.xlu0 %v2840_v7, %s2461_s23  ;;  %2244 = vrot.lane.b32.xlu1 %v2243_v56, %s2460_s26  ;;  %v2278_v7 = vld [vmem:[%s3409_s3 + $0x8] sm:$0xff]  }
 0x1cc   : > { %916 = vmatpush1.bf16.msra.mxu1 %v2278_v7 }
 0x1cd   : > { %917 = vmatprep.subr.bf16.mxu1 %v2456_v3 }
 0x1cf   : > { %778 = vrot.lane.b32.xlu0 %v741_v22, %s2461_s23 }
 0x1d0   : > { %918 = vmatpush1.bf16.msra.mxu1 %v2279_v8 }
 0x1d1   : > { %933 = vmatprep.subr.bf16.mxu1 %v2456_v3 }
 0x1d3   : > { %780 = vrot.lane.b32.xlu0 %v742_v36, %s2461_s23 }
 0x1d4   : > { %934 = vmatpush2.bf16.msra.mxu1 %v2280_v9 }
 0x1d7   : > { %782 = vrot.lane.b32.xlu0 %v743_v43, %s2461_s23 }
 0x215   : > { %v2190_v13 = vpop.permute.xlu0 %2189 }
 0x216   : > { %v2192_v14 = vunpack.i.h.bf16 %v2190_v13  ;;  %v2191_v17 = vunpack.i.l.bf16 %v2190_v13 }
 0x218   : > { %v1079_v18 = vsel %vm894_vm6, %v2191_v17, %v2192_v14 }
 0x219   : > { %v2195_v4 = vpop.permute.xlu1 %2194  ;;  %v1160_v5 = vpop.permute.xlu0 %1159  ;;  %v1095_v22 = vrot.slane %v1079_v18, 7  ;;  %v1127_v23 = vrot.slane %v1079_v18, 1 }
 0x21a   : > { %v2197_v6 = vunpack.i.h.bf16 %v2195_v4  ;;  %v2196_v11 = vunpack.i.l.bf16 %v2195_v4 }
 0x21c   : > { %v1080_v20 = vsel %vm894_vm6, %v2196_v11, %v2197_v6 }
 0x21d   : > { %v1099_v24 = vrot.slane %v1080_v20, 7  ;;  %v1131_v16 = vrot.slane %v1080_v20, 1  ;;  %v1162_v21 = vpop.permute.xlu1 %1161  ;;  %v2200_v28 = vpop.permute.xlu0 %2199 }
 0x21e   : > { %v2202_v3 = vunpack.i.h.bf16 %v2200_v28  ;;  %v2201_v29 = vunpack.i.l.bf16 %v2200_v28  ;;  %v1176_v46 = vsel %vm1175_vm7, %v1160_v5, %v1162_v21 }
 0x21f   : > { %v1103_v30 = vsel %vm407_vm2, %v1095_v22, %v1099_v24  ;;  %v1107_v31 = vsel %vm407_vm2, %v1099_v24, %v1095_v22  ;;  %v1135_v33 = vsel %vm436_vm3, %v1127_v23, %v1131_v16  ;;  %v1139_v34 = vsel %vm436_vm3, %v1131_v16, %v1127_v23 }
 0x220   : > { %v1111_v35 = vsel %vm395_vm0, 0.0, %v1107_v31  ;;  %v1144_v36 = vsel %vm398_vm1, 0.0, %v1139_v34  ;;  %v1081_v47 = vsel %vm894_vm6, %v2201_v29, %v2202_v3 }
 0x221   : > { %v1119_v37 = vpack.c.bf16 %v1103_v30, %v1111_v35  ;;  %v2205_v38 = vpop.permute.xlu1 %2204  ;;  %v1164_v41 = vpop.permute.xlu0 %1163  ;;  %v1151_v42 = vpack.c.bf16 %v1144_v36, %v1135_v33  ;;  %v1096_v51 = vrot.slane %v1081_v47, 7  ;;  %v1128_v54 = vrot.slane %v1081_v47, 1 }
 0x222   : > { %v2207_v48 = vunpack.i.h.bf16 %v2205_v38  ;;  %v2206_v43 = vunpack.i.l.bf16 %v2205_v38 }
 0x223   : > { %v1182_v50 = vsel %vm554_vm5, %v1119_v37, %v1176_v46  ;;  %2008 = vmatprep.mubr.msk.bf16.mxu0 %vm554_vm5, %v1151_v42 }
 0x224   : > { %v1082_v45 = vsel %vm894_vm6, %v2206_v43, %v2207_v48  ;;  %1337 = vmatmul.mubr.bf16.vlgmr.msra.gmra.mxu0 %v1182_v50 }
 0x225   : > { %v1100_v55 = vrot.slane %v1082_v45, 7  ;;  %v1132_v56 = vrot.slane %v1082_v45, 1  ;;  %v1166_v58 = vpop.permute.xlu1 %1165  ;;  %v2210_v59 = vpop.permute.xlu0 %2209 }
 0x226   : > { %v2212_v60 = vunpack.i.h.bf16 %v2210_v59  ;;  %v2211_v62 = vunpack.i.l.bf16 %v2210_v59  ;;  %v1177_v18 = vsel %vm1175_vm7, %v1164_v41, %v1166_v58 }
 0x227   : > { %v1136_v63 = vsel %vm436_vm3, %v1128_v54, %v1132_v56  ;;  %v1140_v0 = vsel %vm436_vm3, %v1132_v56, %v1128_v54  ;;  %v1104_v7 = vsel %vm407_vm2, %v1096_v51, %v1100_v55  ;;  %v1108_v8 = vsel %vm407_vm2, %v1100_v55, %v1096_v51 }
 0x228   : > { %v1146_v9 = vsel %vm398_vm1, 0.0, %v1140_v0  ;;  %v1113_v13 = vsel %vm395_vm0, 0.0, %v1108_v8  ;;  %v1083_v6 = vsel %vm894_vm6, %v2211_v62, %v2212_v60 }
 0x229   : > { %v2215_v14 = vpop.permute.xlu1 %2214  ;;  %v1168_v17 = vpop.permute.xlu0 %1167  ;;  %v1152_v4 = vpack.c.bf16 %v1146_v9, %v1136_v63  ;;  %v1120_v5 = vpack.c.bf16 %v1104_v7, %v1113_v13  ;;  %v1097_v24 = vrot.slane %v1083_v6, 7  ;;  %v1129_v16 = vrot.slane %v1083_v6, 1 }
 0x22a   : > { %v2217_v11 = vunpack.i.h.bf16 %v2215_v14  ;;  %v2216_v20 = vunpack.i.l.bf16 %v2215_v14 }
 0x22b   : > { %2009 = vmatprep.mubr.msk.bf16.mxu0 %vm554_vm5, %v1152_v4  ;;  %v1186_v22 = vsel %vm554_vm5, %v1120_v5, %v1177_v18 }
 0x22c   : > { %v1084_v23 = vsel %vm894_vm6, %v2216_v20, %v2217_v11  ;;  %1345 = vmatmul.mubr.bf16.gmra.mxu0 %v1186_v22 }
 0x22d   : > { %v1101_v21 = vrot.slane %v1084_v23, 7  ;;  %v1133_v28 = vrot.slane %v1084_v23, 1  ;;  %v1170_v3 = vpop.permute.xlu1 %1169  ;;  %v2220_v29 = vpop.permute.xlu0 %2219 }
 0x22e   : > { %v2222_v30 = vunpack.i.h.bf16 %v2220_v29  ;;  %v2221_v31 = vunpack.i.l.bf16 %v2220_v29  ;;  %v1178_v48 = vsel %vm1175_vm7, %v1168_v17, %v1170_v3 }
 0x22f   : > { %v1137_v33 = vsel %vm436_vm3, %v1129_v16, %v1133_v28  ;;  %v1141_v34 = vsel %vm436_vm3, %v1133_v28, %v1129_v16  ;;  %v1105_v35 = vsel %vm407_vm2, %v1097_v24, %v1101_v21  ;;  %v1109_v36 = vsel %vm407_vm2, %v1101_v21, %v1097_v24 }
 0x230   : > { %v1148_v37 = vsel %vm398_vm1, 0.0, %v1141_v34  ;;  %v1115_v38 = vsel %vm395_vm0, 0.0, %v1109_v36  ;;  %v1085_v43 = vsel %vm894_vm6, %v2221_v31, %v2222_v30 }
 0x231   : > { %v2225_v41 = vpop.permute.xlu1 %2224  ;;  %v1172_v42 = vpop.permute.xlu0 %1171  ;;  %v1153_v46 = vpack.c.bf16 %v1148_v37, %v1137_v33  ;;  %v1121_v47 = vpack.c.bf16 %v1105_v35, %v1115_v38  ;;  %v1098_v55 = vrot.slane %v1085_v43, 7  ;;  %v1130_v56 = vrot.slane %v1085_v43, 1 }
 0x232   : > { %v2227_v50 = vunpack.i.h.bf16 %v2225_v41  ;;  %v2226_v45 = vunpack.i.l.bf16 %v2225_v41 }
 0x233   : > { %2010 = vmatprep.mubr.msk.bf16.mxu0 %vm554_vm5, %v1153_v46  ;;  %v1190_v51 = vsel %vm554_vm5, %v1121_v47, %v1178_v48 }
 0x234   : > { %v1086_v54 = vsel %vm894_vm6, %v2226_v45, %v2227_v50  ;;  %1353 = vmatmul.mubr.bf16.gmra.mxu0 %v1190_v51 }
 0x235   : > { %v1102_v58 = vrot.slane %v1086_v54, 7  ;;  %v1134_v59 = vrot.slane %v1086_v54, 1  ;;  %v1174_v60 = vpop.permute.xlu1 %1173  ;;  %v2230_v62 = vpop.permute.xlu0 %2229 }
 0x236   : > { %v2232_v63 = vunpack.i.h.bf16 %v2230_v62  ;;  %v2231_v0 = vunpack.i.l.bf16 %v2230_v62  ;;  %v1179_v30 = vsel %vm1175_vm7, %v1172_v42, %v1174_v60 }
 0x237   : > { %v1142_v7 = vsel %vm436_vm3, %v1134_v59, %v1130_v56  ;;  %v1110_v8 = vsel %vm407_vm2, %v1102_v58, %v1098_v55  ;;  %v1138_v14 = vsel %vm436_vm3, %v1130_v56, %v1134_v59  ;;  %v1106_v17 = vsel %vm407_vm2, %v1098_v55, %v1102_v58 }
 0x238   : > { %v716_v9 = vrot.slane %v2232_v63, 7  ;;  %v712_v13 = vrot.slane %v2231_v0, 7  ;;  %v748_v4 = vrot.slane %v2232_v63, 1  ;;  %v744_v5 = vrot.slane %v2231_v0, 1 }
 0x239   : > { %v2235_v18 = vpop.permute.xlu1 %2234  ;;  %v2240_v6 = vpop.permute.xlu0 %2239  ;;  %v1150_v11 = vsel %vm398_vm1, 0.0, %v1142_v7  ;;  %v1117_v20 = vsel %vm395_vm0, 0.0, %v1110_v8 }
 0x23a   : > { %v2237_v22 = vunpack.i.h.bf16 %v2235_v18  ;;  %v2236_v23 = vunpack.i.l.bf16 %v2235_v18  ;;  %v2242_v24 = vunpack.i.h.bf16 %v2240_v6  ;;  %v2241_v16 = vunpack.i.l.bf16 %v2240_v6 }
 0x23b   : > { %v1154_v21 = vpack.c.bf16 %v1150_v11, %v1138_v14  ;;  %v1122_v28 = vpack.c.bf16 %v1106_v17, %v1117_v20  ;;  %v3035_v3 = vsel %vm407_vm2, %v712_v13, %v716_v9  ;;  %v724_v29 = vsel %vm407_vm2, %v716_v9, %v712_v13 }
 0x23c   : > { %v717_v31 = vrot.slane %v2237_v22, 7  ;;  %v713_v33 = vrot.slane %v2236_v23, 7  ;;  %v749_v34 = vrot.slane %v2237_v22, 1  ;;  %v745_v35 = vrot.slane %v2236_v23, 1 }
 0x23d   : > { %v718_v36 = vrot.slane %v2242_v24, 7  ;;  %v714_v37 = vrot.slane %v2241_v16, 7  ;;  %2011 = vmatprep.mubr.msk.bf16.mxu0 %vm554_vm5, %v1154_v21  ;;  %v2245_v38 = vpop.permute.xlu1 %2244  ;;  %v1194_v41 = vsel %vm554_vm5, %v1122_v28, %v1179_v30  ;;  %v728_v48 = vsel %vm395_vm0, 0.0, %v724_v29 }
 0x23e   : > { %v2247_v46 = vunpack.i.h.bf16 %v2245_v38  ;;  %v2246_v47 = vunpack.i.l.bf16 %v2245_v38  ;;  %1361 = vmatmul.mubr.bf16.gmra.mxu0 %v1194_v41  ;;  %v736_v43 = vpack.c.bf16 %v3035_v3, %v728_v48  ;;  %v752_v42 = vsel %vm436_vm3, %v744_v5, %v748_v4  ;;  %v2284_v41 = vld [vmem:[%s3413_s7 + $0x30] sm:$0xff]  }
 0x23f   : > { %v756_v50 = vsel %vm436_vm3, %v748_v4, %v744_v5  ;;  %v721_v45 = vsel %vm407_vm2, %v713_v33, %v717_v31  ;;  %v750_v51 = vrot.slane %v2242_v24, 1  ;;  %v746_v54 = vrot.slane %v2241_v16, 1 }
 0x240   : > { %v719_v55 = vrot.slane %v2247_v46, 7  ;;  %v715_v56 = vrot.slane %v2246_v47, 7  ;;  %v751_v58 = vrot.slane %v2247_v46, 1  ;;  %v761_v59 = vsel %vm398_vm1, 0.0, %v756_v50  ;;  %v2287_v50 = vld [vmem:[%s3413_s7 + $0x60] sm:$0xff]  }
 0x241   : > { %v725_v60 = vsel %vm407_vm2, %v717_v31, %v713_v33  ;;  %v753_v62 = vsel %vm436_vm3, %v745_v35, %v749_v34  ;;  %v768_v63 = vpack.c.bf16 %v761_v59, %v752_v42  ;;  %v757_v7 = vsel %vm436_vm3, %v749_v34, %v745_v35  ;;  %v2281_v31 = vld [vmem:[%s3413_s7 + $0x78] sm:$0xff]   ;;  %v777_v33 = vpop.permute.xlu0 %776 }
 0x242   : > { %v730_v0 = vsel %vm395_vm0, 0.0, %v725_v60  ;;  %v722_v8 = vsel %vm407_vm2, %v714_v37, %v718_v36  ;;  %v747_v9 = vrot.slane %v2246_v47, 1  ;;  %v763_v14 = vsel %vm398_vm1, 0.0, %v757_v7  ;;  %2046 = vmatprep.subr.bf16.mxu1 %v2281_v31  ;;  %v2282_v34 = vld [vmem:[%s3413_s7 + $0x38] sm:$0xff]   ;;  %v2285_v47 = vld [vmem:[%s3413_s7 + $0x68] sm:$0xff]   ;;  %v2291_v60 = vld [vmem:[%s3413_s7 + $0x50] sm:$0xff]  }
 0x243   : > { %v737_v13 = vpack.c.bf16 %v721_v45, %v730_v0  ;;  %v726_v17 = vsel %vm407_vm2, %v718_v36, %v714_v37  ;;  %788 = vrot.lane.b32.xlu1 %v768_v63, %s2462_s14  ;;  %v769_v4 = vpack.c.bf16 %v763_v14, %v753_v62  ;;  %v758_v18 = vsel %vm436_vm3, %v750_v51, %v746_v54  ;;  %v2283_v37 = vld [vmem:[%s3413_s7 + $0x70] sm:$0xff]   ;;  %v2293_v7 = vld [vmem:[%s3413_s7 + $0x48] sm:$0xff]  }
 0x244   : > { %v732_v5 = vsel %vm395_vm0, 0.0, %v726_v17  ;;  %v3074_v6 = vsel %vm407_vm2, %v715_v56, %v719_v55  ;;  %v727_v20 = vsel %vm407_vm2, %v719_v55, %v715_v56  ;;  %v754_v23 = vsel %vm436_vm3, %v746_v54, %v750_v51  ;;  %v2288_v54 = vld [vmem:[%s3413_s7 + $0x20] sm:$0xff]   ;;  %v2289_v55 = vld [vmem:[%s3413_s7 + $0x58] sm:$0xff]   ;;  %v2292_v0 = vld [vmem:[%s3413_s7 + $0x10] sm:$0xff]  }
 0x245   : > { %v738_v11 = vpack.c.bf16 %v722_v8, %v732_v5  ;;  %v3080_v22 = vsel %vm395_vm0, 0.0, %v727_v20  ;;  %v765_v24 = vsel %vm398_vm1, 0.0, %v758_v18  ;;  %v759_v21 = vsel %vm436_vm3, %v751_v58, %v747_v9  ;;  %v779_v48 = vpop.permute.xlu0 %778  ;;  %v3154_v17 = vld [vmem:[%s3412_s6] ss:$0 sm:$0xff] }
 0x246   : > { %v739_v16 = vpack.c.bf16 %v3074_v6, %v3080_v22  ;;  %v770_v28 = vpack.c.bf16 %v765_v24, %v754_v23  ;;  %v755_v3 = vsel %vm436_vm3, %v747_v9, %v751_v58  ;;  %v767_v29 = vsel %vm398_vm1, 0.0, %v759_v21  ;;  %v2290_v58 = vld [vmem:[%s3413_s7 + $0x18] sm:$0xff]   ;;  %v2294_v9 = vld [vmem:[%s3413_s7 + $0x8] sm:$0xff]   ;;  %v2296_v5 = vld [vmem:[%s3413_s7] sm:$0xff]  }
 0x247   : > { %790 = vrot.lane.b32.xlu1 %v769_v4, %s2462_s14  ;;  %v771_v30 = vpack.c.bf16 %v767_v29, %v755_v3  ;;  %v799_v35 = vsel %vm796_vm8, %v736_v43, %v777_v33  ;;  %v2286_v43 = vld [vmem:[%s3413_s7 + $0x28] sm:$0xff]   ;;  %v802_v42 = vsel %vm796_vm8, %v737_v13, %v779_v48  ;;  %v2295_v4 = vld [vmem:[%s3413_s7 + $0x40] sm:$0xff]  }
 0x249   : > { %v781_v56 = vpop.permute.xlu0 %780 }
 0x24a   : > { %v805_v59 = vsel %vm796_vm8, %v738_v11, %v781_v56  ;;  %v3166_v11 = vld [vmem:[%s3413_s7 + $0x88] sm:$0xff]  }
 0x24b   : > { %792 = vrot.lane.b32.xlu1 %v770_v28, %s2462_s14  ;;  %2092 = vmatprep.subr.bf16.mxu0 %v3166_v11 }
 0x24c   : > { %2093 = vmatpush3.bf16.msra.mxu0 %v3166_v11 }
 0x24d   : > { %v783_v8 = vpop.permute.xlu0 %782 }
 0x24e   : > { %v808_v13 = vsel %vm796_vm8, %v739_v16, %v783_v8  ;;  %v3175_v16 = vld [vmem:[%s3413_s7 + $0x80] sm:$0xff]  }
 0x24f   : > { %794 = vrot.lane.b32.xlu1 %v771_v30, %s2462_s14  ;;  %2094 = vmatprep.subr.bf16.mxu0 %v3175_v16 }
 0x250   : > { %2095 = vmatpush3.bf16.msra.mxu0 %v3175_v16 }
 0x2b5   : > { %v789_v36 = vpop.permute.xlu1 %788 }
 0x2b6   : > { %1991 = vmatprep.mubr.msk.bf16.mxu1 %vm894_vm6, %v789_v36  ;;  %v811_v38 = vsel %vm809_vm9, %v799_v35, %v789_v36 }
 0x2b7   : > { %936 = vmatmul.mubr.bf16.vlgmr.msra.gmra.mxu1 %v811_v38 }
 0x2b8   : > { %2047 = vmatpush3.bf16.msra.mxu1 %v2282_v34 }
 0x2b9   : > { %v791_v46 = vpop.permute.xlu1 %790  ;;  %2048 = vmatprep.subr.bf16.mxu1 %v2283_v37 }
 0x2ba   : > { %1992 = vmatprep.mubr.msk.bf16.mxu1 %vm894_vm6, %v791_v46  ;;  %v814_v45 = vsel %vm809_vm9, %v802_v42, %v791_v46 }
 0x2bc   : > { %2049 = vmatpush3.bf16.msra.mxu1 %v2284_v41 }
 0x2bd   : > { %2050 = vmatprep.subr.bf16.mxu1 %v2285_v47  ;;  %v793_v51 = vpop.permute.xlu1 %792 }
 0x2be   : > { %v817_v62 = vsel %vm809_vm9, %v805_v59, %v793_v51 }
 0x2bf   : > { %944 = vmatmul.mubr.bf16.gmra.mxu1 %v814_v45 }
 0x2c0   : > { %1993 = vmatprep.mubr.msk.bf16.mxu1 %vm894_vm6, %v793_v51  ;;  %2051 = vmatpush3.bf16.msra.mxu1 %v2286_v43 }
 0x2c1   : > { %2052 = vmatprep.subr.bf16.mxu1 %v2287_v50  ;;  %v795_v63 = vpop.permute.xlu1 %794 }
 0x2c2   : > { %v820_v14 = vsel %vm809_vm9, %v808_v13, %v795_v63 }
 0x2c4   : > { %2053 = vmatpush3.bf16.msra.mxu1 %v2288_v54 }
 0x2c5   : > { %2054 = vmatprep.subr.bf16.mxu1 %v2289_v55 }
 0x2c7   : > { %952 = vmatmul.mubr.bf16.gmra.mxu1 %v817_v62 }
 0x2c8   : > { %1994 = vmatprep.mubr.msk.bf16.mxu1 %vm894_vm6, %v795_v63  ;;  %2055 = vmatpush3.bf16.msra.mxu1 %v2290_v58 }
 0x2c9   : > { %2056 = vmatprep.subr.bf16.mxu1 %v2291_v60 }
 0x2cc   : > { %2057 = vmatpush3.bf16.msra.mxu1 %v2292_v0 }
 0x2cd   : > { %2058 = vmatprep.subr.bf16.mxu1 %v2293_v7 }
 0x2cf   : > { %960 = vmatmul.mubr.bf16.gmra.mxu1 %v820_v14 }
 0x2d0   : > { %2059 = vmatpush3.bf16.msra.mxu1 %v2294_v9 }
 0x2d1   : > { %2060 = vmatprep.subr.bf16.mxu1 %v2295_v4 }
 0x2d4   : > { %2061 = vmatpush3.bf16.msra.mxu1 %v2296_v5 }
 0x2d5   : > { %2104 = vmatprep.subr.bf16.mxu1 %v3166_v11 }
 0x2e4   : > { %v1338_v18 = vpop.f32.mrf.mxu0 }
 0x2e5   : > { %v1376_v6 = vadd.f32 %v3154_v17, %v1338_v18 }
 0x2e6   : > { %v1340_v20 = vpop.f32.mrf.mxu0 }
 0x2e7   : > { %v1384_v22 = vmax.f32 %v1376_v6, 0.0 }
 0x2e8   : > { %v1341_v23 = vpop.f32.mrf.mxu0 }
 0x2e9   : > { %v1377_v24 = vadd.f32 %v3154_v17, %v1341_v23  ;;  %v1392_v3 = vrot.slane %v1384_v22, 7  ;;  %v1424_v29 = vrot.slane %v1384_v22, 1 }
 0x2ea   : > { %v1343_v21 = vpop.f32.mrf.mxu0 }
 0x2eb   : > { %v1385_v28 = vmax.f32 %v1377_v24, 0.0 }
 0x2ec   : > { %v1346_v30 = vpop.f32.mrf.mxu0 }
 0x2ed   : > { %v1396_v31 = vrot.slane %v1385_v28, 7  ;;  %v1428_v33 = vrot.slane %v1385_v28, 1  ;;  %v1378_v34 = vadd.f32 %v3154_v17, %v1346_v30  ;;  %v1420_v35 = vpack.c.bf16 %v1385_v28, %v1384_v22 }
 0x2ee   : > { %v1348_v36 = vpop.f32.mrf.mxu0 }
 0x2ef   : > { %1456 = vrot.lane.b32.xlu0 %v1420_v35, %s2462_s14  ;;  %v1432_v37 = vsel %vm436_vm3, %v1424_v29, %v1428_v33  ;;  %v1436_v38 = vsel %vm436_vm3, %v1428_v33, %v1424_v29  ;;  %v3187_v41 = vsel %vm407_vm2, %v1392_v3, %v1396_v31  ;;  %v1386_v46 = vmax.f32 %v1378_v34, 0.0 }
 0x2f0   : > { %v1349_v47 = vpop.f32.mrf.mxu0  ;;  %v1441_v48 = vsel %vm398_vm1, 0.0, %v1436_v38  ;;  %v1404_v43 = vsel %vm407_vm2, %v1396_v31, %v1392_v3 }
 0x2f1   : > { %v1379_v42 = vadd.f32 %v3154_v17, %v1349_v47  ;;  %v1448_v50 = vpack.c.bf16 %v1441_v48, %v1432_v37  ;;  %v3196_v51 = vsel %vm395_vm0, 0.0, %v1404_v43  ;;  %v1393_v56 = vrot.slane %v1386_v46, 7 }
 0x2f2   : > { %v1351_v45 = vpop.f32.mrf.mxu0  ;;  %v1416_v55 = vpack.c.bf16 %v3187_v41, %v3196_v51  ;;  %v1425_v58 = vrot.slane %v1386_v46, 1 }
 0x2f3   : > { %v1387_v54 = vmax.f32 %v1379_v42, 0.0  ;;  %1468 = vrot.lane.b32.xlu1 %v1448_v50, %s2460_s26 }
 0x2f4   : > { %v1354_v59 = vpop.f32.mrf.mxu0 }
 0x2f5   : > { %v1397_v60 = vrot.slane %v1387_v54, 7  ;;  %v1429_v62 = vrot.slane %v1387_v54, 1  ;;  %v1380_v63 = vadd.f32 %v3154_v17, %v1354_v59  ;;  %v1421_v0 = vpack.c.bf16 %v1387_v54, %v1386_v46 }
 0x2f6   : > { %v1356_v7 = vpop.f32.mrf.mxu0 }
 0x2f7   : > { %1458 = vrot.lane.b32.xlu0 %v1421_v0, %s2462_s14  ;;  %v1433_v8 = vsel %vm436_vm3, %v1425_v58, %v1429_v62  ;;  %v1437_v9 = vsel %vm436_vm3, %v1429_v62, %v1425_v58  ;;  %v3209_v13 = vsel %vm407_vm2, %v1393_v56, %v1397_v60  ;;  %v1388_v14 = vmax.f32 %v1380_v63, 0.0 }
 0x2f8   : > { %v1357_v4 = vpop.f32.mrf.mxu0  ;;  %v1443_v5 = vsel %vm398_vm1, 0.0, %v1437_v9  ;;  %v1405_v18 = vsel %vm407_vm2, %v1397_v60, %v1393_v56 }
 0x2f9   : > { %v1381_v6 = vadd.f32 %v3154_v17, %v1357_v4  ;;  %v1449_v20 = vpack.c.bf16 %v1443_v5, %v1433_v8  ;;  %v3218_v23 = vsel %vm395_vm0, 0.0, %v1405_v18  ;;  %v1394_v28 = vrot.slane %v1388_v14, 7 }
 0x2fa   : > { %v1359_v22 = vpop.f32.mrf.mxu0  ;;  %v1417_v21 = vpack.c.bf16 %v3209_v13, %v3218_v23  ;;  %v1426_v3 = vrot.slane %v1388_v14, 1 }
 0x2fb   : > { %v1389_v24 = vmax.f32 %v1381_v6, 0.0  ;;  %1470 = vrot.lane.b32.xlu1 %v1449_v20, %s2460_s26 }
 0x2fd   : > { %v1398_v29 = vrot.slane %v1389_v24, 7  ;;  %v1430_v30 = vrot.slane %v1389_v24, 1  ;;  %v1422_v31 = vpack.c.bf16 %v1389_v24, %v1388_v14 }
 0x2fe   : > { %v1362_v33 = vpop.f32.mrf.mxu0 }
 0x2ff   : > { %1460 = vrot.lane.b32.xlu0 %v1422_v31, %s2462_s14  ;;  %v1434_v34 = vsel %vm436_vm3, %v1426_v3, %v1430_v30  ;;  %v1438_v35 = vsel %vm436_vm3, %v1430_v30, %v1426_v3  ;;  %v1402_v36 = vsel %vm407_vm2, %v1394_v28, %v1398_v29  ;;  %v1406_v37 = vsel %vm407_vm2, %v1398_v29, %v1394_v28 }
 0x300   : > { %v1382_v38 = vadd.f32 %v3154_v17, %v1362_v33  ;;  %v1445_v46 = vsel %vm398_vm1, 0.0, %v1438_v35  ;;  %v1412_v47 = vsel %vm395_vm0, 0.0, %v1406_v37  ;;  %v1364_v48 = vpop.f32.mrf.mxu0 }
 0x301   : > { %v1450_v43 = vpack.c.bf16 %v1445_v46, %v1434_v34  ;;  %v1418_v42 = vpack.c.bf16 %v1402_v36, %v1412_v47 }
 0x302   : > { %v1390_v50 = vmax.f32 %v1382_v38, 0.0  ;;  %v1365_v45 = vpop.f32.mrf.mxu0 }
 0x303   : > { %1472 = vrot.lane.b32.xlu1 %v1450_v43, %s2460_s26  ;;  %v1383_v54 = vadd.f32 %v3154_v17, %v1365_v45 }
 0x304   : > { %v1367_v56 = vpop.f32.mrf.mxu0  ;;  %v1395_v59 = vrot.slane %v1390_v50, 7  ;;  %v1427_v60 = vrot.slane %v1390_v50, 1 }
 0x305   : > { %v1391_v58 = vmax.f32 %v1383_v54, 0.0 }
 0x307   : > { %v1399_v62 = vrot.slane %v1391_v58, 7  ;;  %v1431_v63 = vrot.slane %v1391_v58, 1  ;;  %v1423_v0 = vpack.c.bf16 %v1391_v58, %v1390_v50 }
 0x309   : > { %1462 = vrot.lane.b32.xlu0 %v1423_v0, %s2462_s14  ;;  %v1435_v7 = vsel %vm436_vm3, %v1427_v60, %v1431_v63  ;;  %v1439_v8 = vsel %vm436_vm3, %v1431_v63, %v1427_v60  ;;  %v1403_v9 = vsel %vm407_vm2, %v1395_v59, %v1399_v62  ;;  %v1407_v17 = vsel %vm407_vm2, %v1399_v62, %v1395_v59  ;;  %s2463_s14 = smov 48  }
 0x30a   : > { %v1447_v13 = vsel %vm398_vm1, 0.0, %v1439_v8  ;;  %v1414_v14 = vsel %vm395_vm0, 0.0, %v1407_v17 }
 0x30b   : > { %v1451_v4 = vpack.c.bf16 %v1447_v13, %v1435_v7  ;;  %v1419_v5 = vpack.c.bf16 %v1403_v9, %v1414_v14 }
 0x30d   : > { %1474 = vrot.lane.b32.xlu1 %v1451_v4, %s2460_s26  ;;  %1809 = vrot.lane.b32.xlu0 %v2825_v53, %s2463_s14 }
 0x311   : > { %1811 = vrot.lane.b32.xlu1 %v2833_v61, %s2463_s14  ;;  %1813 = vrot.lane.b32.xlu0 %v2846_v12, %s2463_s14 }
 0x315   : > { %1815 = vrot.lane.b32.xlu1 %v2859_v19, %s2463_s14  ;;  %1817 = vrot.lane.b32.xlu0 %v2871_v26, %s2463_s14 }
 0x319   : > { %1819 = vrot.lane.b32.xlu1 %v2883_v32, %s2463_s14 }
 0x361   : > { %v1457_v1 = vpop.permute.xlu0 %1456 }
 0x362   : > { %v1478_v61 = vsel %vm809_vm9, %v1416_v55, %v1457_v1 }
 0x365   : > { %v1469_v2 = vpop.permute.xlu1 %1468 }
 0x366   : > { %2096 = vmatprep.mubr.msk.bf16.mxu0 %vm493_vm4, %v1469_v2  ;;  %v1493_v53 = vsel %vm554_vm5, %v1457_v1, %v1469_v2 }
 0x367   : > { %1688 = vmatprep.mubr.bf16.mxu1 %v1493_v53 }
 0x368   : > { %1689 = vmatmul.mubr.bf16.vlgmr.msra.gmra.mxu1 %v1478_v61 }
 0x369   : > { %2106 = vmatpush3.bf16.msra.mxu1 %v3166_v11  ;;  %v1459_v12 = vpop.permute.xlu0 %1458  ;;  %v1995_v11 = vld [vmem:[%s3410_s4] ss:$0 sm:$0xff] }
 0x36a   : > { %2105 = vmatprep.subr.bf16.mxu1 %v3175_v16  ;;  %v1482_v32 = vsel %vm809_vm9, %v1417_v21, %v1459_v12 }
 0x36d   : > { %v1471_v19 = vpop.permute.xlu1 %1470  ;;  %2107 = vmatpush3.bf16.msra.mxu1 %v3175_v16 }
 0x36e   : > { %2097 = vmatmul.mubr.msk.bf16.vlgmr.msra.gmra.mxu0 %vm493_vm4, %v1471_v19  ;;  %v1496_v26 = vsel %vm554_vm5, %v1459_v12, %v1471_v19 }
 0x36f   : > { %1696 = vmatprep.mubr.bf16.mxu1 %v1496_v26 }
 0x370   : > { %1697 = vmatmul.mubr.bf16.gmra.mxu1 %v1482_v32 }
 0x371   : > { %v1461_v41 = vpop.permute.xlu0 %1460 }
 0x372   : > { %v1486_v18 = vsel %vm809_vm9, %v1418_v42, %v1461_v41 }
 0x375   : > { %v1473_v51 = vpop.permute.xlu1 %1472 }
 0x376   : > { %v1499_v55 = vsel %vm554_vm5, %v1461_v41, %v1473_v51 }
 0x377   : > { %1704 = vmatprep.mubr.bf16.mxu1 %v1499_v55  ;;  %v937_v16 = vpop.f32.mrf.mxu1 }
 0x378   : > { %1705 = vmatmul.mubr.bf16.gmra.mxu1 %v1486_v18  ;;  %v975_v6 = vadd.f32 %v1995_v11, %v937_v16 }
 0x379   : > { %v939_v20 = vpop.f32.mrf.mxu1 }
 0x37a   : > { %v983_v22 = vmax.f32 %v975_v6, 0.0 }
 0x37b   : > { %v940_v23 = vpop.f32.mrf.mxu1  ;;  %v1463_v3 = vpop.permute.xlu0 %1462 }
 0x37c   : > { %v976_v24 = vadd.f32 %v1995_v11, %v940_v23  ;;  %999 = vrot.lane.b32.xlu0 %v983_v22, %s2460_s26  ;;  %v1490_v35 = vsel %vm809_vm9, %v1419_v5, %v1463_v3 }
 0x37d   : > { %v942_v21 = vpop.f32.mrf.mxu1 }
 0x37e   : > { %v984_v28 = vmax.f32 %v976_v24, 0.0 }
 0x37f   : > { %v945_v29 = vpop.f32.mrf.mxu1  ;;  %v1475_v30 = vpop.permute.xlu1 %1474 }
 0x380   : > { %v977_v31 = vadd.f32 %v1995_v11, %v945_v29  ;;  %1001 = vrot.lane.b32.xlu1 %v984_v28, %s2460_s26  ;;  %v1502_v33 = vsel %vm554_vm5, %v1463_v3, %v1475_v30  ;;  %v1810_v17 = vpop.permute.xlu0 %1809 }
 0x381   : > { %v947_v34 = vpop.f32.mrf.mxu1  ;;  %1712 = vmatprep.mubr.bf16.mxu1 %v1502_v33 }
 0x382   : > { %v985_v36 = vmax.f32 %v977_v31, 0.0  ;;  %1713 = vmatmul.mubr.bf16.gmra.mxu1 %v1490_v35 }
 0x383   : > { %v948_v37 = vpop.f32.mrf.mxu1  ;;  %2100 = vmatprep.mubr.msk.bf16.mxu1 %vm493_vm4, %v1473_v51  ;;  %v3298_v13 = vpop.permute.xlu1 %1811 }
 0x384   : > { %v978_v38 = vadd.f32 %v1995_v11, %v948_v37  ;;  %1003 = vrot.lane.b32.xlu0 %v985_v36, %s2460_s26  ;;  %v1814_v14 = vpop.permute.xlu0 %1813 }
 0x385   : > { %v950_v46 = vpop.f32.mrf.mxu1 }
 0x386   : > { %v986_v47 = vmax.f32 %v978_v38, 0.0 }
 0x387   : > { %v953_v48 = vpop.f32.mrf.mxu1  ;;  %v3300_v4 = vpop.permute.xlu1 %1815 }
 0x388   : > { %v979_v43 = vadd.f32 %v1995_v11, %v953_v48  ;;  %1005 = vrot.lane.b32.xlu1 %v986_v47, %s2460_s26  ;;  %v3302_v5 = vpop.permute.xlu0 %1817 }
 0x389   : > { %v955_v42 = vpop.f32.mrf.mxu1 }
 0x38a   : > { %v987_v50 = vmax.f32 %v979_v43, 0.0  ;;  %2101 = vmatmul.mubr.msk.bf16.vlgmr.msra.gmra.mxu1 %vm493_vm4, %v1475_v30 }
 0x38b   : > { %v956_v45 = vpop.f32.mrf.mxu1  ;;  %v3305_v1 = vpop.permute.xlu1 %1819 }
 0x38c   : > { %v980_v54 = vadd.f32 %v1995_v11, %v956_v45  ;;  %1007 = vrot.lane.b32.xlu0 %v987_v50, %s2460_s26 }
 0x38d   : > { %v958_v56 = vpop.f32.mrf.mxu1 }
 0x38e   : > { %v988_v58 = vmax.f32 %v980_v54, 0.0 }
 0x38f   : > { %v961_v59 = vpop.f32.mrf.mxu1 }
 0x390   : > { %v981_v60 = vadd.f32 %v1995_v11, %v961_v59  ;;  %1009 = vrot.lane.b32.xlu1 %v988_v58, %s2460_s26 }
 0x391   : > { %v963_v62 = vpop.f32.mrf.mxu1 }
 0x392   : > { %v989_v63 = vmax.f32 %v981_v60, 0.0 }
 0x393   : > { %v964_v0 = vpop.f32.mrf.mxu1 }
 0x394   : > { %v982_v7 = vadd.f32 %v1995_v11, %v964_v0  ;;  %1011 = vrot.lane.b32.xlu0 %v989_v63, %s2460_s26 }
 0x395   : > { %v966_v8 = vpop.f32.mrf.mxu1 }
 0x396   : > { %v990_v9 = vmax.f32 %v982_v7, 0.0 }
 0x398   : > { %1013 = vrot.lane.b32.xlu1 %v990_v9, %s2460_s26  ;;  %1821 = vrot.lane.b32.xlu0 %v2895_v40, %s2463_s14  ;;  %s3309_s26 = scalar_lea.vmem [#allocation8], %s1969_s1 }
 0x399   : > { %s1864_s15 = sshll.u32 %s3309_s26, 4  ;;  %s3360_s15 = int_to_ptr.vmem [resolvable:$true] %s1864_s15 }
 0x39a   : > { %s2379_s20 = scalar_lea.vmem %s3360_s15, 2048 }
 0x39b   : > { %p2380_p0 = scmp.ne.s32.totalorder %s3360_s15, %s2379_s20 }
 0x39c   : > { %1823 = vrot.lane.b32.xlu1 %v2907_v49, %s2463_s14  ;;  %s2464_s14 = smov [#allocation8]  }
 0x39d   : > { %p2381_p7 = pnand %p2380_p0, %p3439_p2  ;;  %s2383_s23 = sshll.u32 %s2464_s14, 4  ;;  %s2384_s23 = int_to_ptr.vmem [resolvable:$false] %s2383_s23 }
 0x39e   : > { %s2385_s22 = scalar_lea.vmem %s2384_s23, 4096  ;;  %p2386_p12 = scmp.lt.s32.totalorder %s3360_s15, %s2384_s23 }
 0x39f   : > { %p2382_p11 = pneg %p2381_p7  ;;  %p2387_p13 = scmp.lt.s32.totalorder %s2385_s22, %s2379_s20 }
 0x3a1   : > { %p2388_p3 = por %p2387_p13, %p2386_p12 }
 0x3a3   : > { %p2389_p5 = pnand %p2388_p3, %p2382_p11 }
 0x3ee   : > { %v1000_v2 = vpop.permute.xlu0 %999 }
 0x3ef   : > { %v1023_v53 = vsel %vm554_vm5, %v2823_v52, %v1000_v2 }
 0x3f0   : > { %1031 = vst [vmem:[%s3309_s26] sm:$0xff] %v1023_v53 }
 0x3f2   : > { %v1002_v40 = vpop.permute.xlu1 %1001 }
 0x3f3   : > { %v1024_v49 = vsel %vm554_vm5, %v2828_v57, %v1002_v40 }
 0x3f4   : > { %1032 = vst [vmem:[%s3309_s26 + $0x10] sm:$0xff] %v1024_v49 }
 0x3f6   : > { %v1004_v61 = vpop.permute.xlu0 %1003 }
 0x3f7   : > { %v1025_v12 = vsel %vm554_vm5, %v2844_v10, %v1004_v61 }
 0x3f8   : > { %1033 = vst [vmem:[%s3309_s26 + $0x20] sm:$0xff] %v1025_v12 }
 0x3fa   : > { %v1006_v52 = vpop.permute.xlu1 %1005 }
 0x3fb   : > { %v1026_v19 = vsel %vm554_vm5, %v2852_v15, %v1006_v52 }
 0x3fc   : > { %1034 = vst [vmem:[%s3309_s26 + $0x30] sm:$0xff] %v1026_v19 }
 0x3fe   : > { %v1008_v26 = vpop.permute.xlu0 %1007 }
 0x3ff   : > { %v1027_v32 = vsel %vm554_vm5, %v2869_v25, %v1008_v26 }
 0x400   : > { %1035 = vst [vmem:[%s3309_s26 + $0x40] sm:$0xff] %v1027_v32 }
 0x402   : > { %v1010_v41 = vpop.permute.xlu1 %1009 }
 0x403   : > { %v1028_v57 = vsel %vm554_vm5, %v2876_v27, %v1010_v41  ;;  %v2035_v27 = vld [vmem:[%s3414_s8] ss:$0 sm:$0xff] }
 0x404   : > { %1036 = vst [vmem:[%s3309_s26 + $0x50] sm:$0xff] %v1028_v57 }
 0x406   : > { %v1012_v51 = vpop.permute.xlu0 %1011 }
 0x407   : > { %v1029_v10 = vsel %vm554_vm5, %v2893_v39, %v1012_v51 }
 0x408   : > { %1037 = vst [vmem:[%s3309_s26 + $0x60] sm:$0xff] %v1029_v10 }
 0x40a   : > { %v1014_v11 = vpop.permute.xlu1 %1013  ;;  %v1822_v26 = vpop.permute.xlu0 %1821 }
 0x40b   : > { %v1030_v15 = vsel %vm554_vm5, %v2900_v44, %v1014_v11 }
 0x40c   : > { %1038 = vst [vmem:[%s3309_s26 + $0x70] sm:$0xff] %v1030_v15 }
 0x428   : > { %v2062_v55 = vpop.f32.mrf.mxu1 }
 0x42a   : > { %v2063_v18 = vpop.f32.mrf.mxu1 }
 0x42b   : > { %v2064_v20 = vadd.f32 %v2063_v18, %v2062_v55  ;;  %v1824_v18 = vpop.permute.xlu1 %1823 }
 0x42c   : > { %v2065_v16 = vpop.f32.mrf.mxu1 }
 0x42e   : > { %v2066_v25 = vpop.f32.mrf.mxu1  ;;  %v2098_v6 = vpop.f32.mrf.mxu0 }
 0x42f   : > { %v2067_v28 = vadd.f32 %v2066_v25, %v2065_v16 }
 0x430   : > { %v2068_v22 = vpop.f32.mrf.mxu1  ;;  %v1755_v23 = vpop.f32.mrf.mxu0 }
 0x431   : > { %v1756_v24 = vadd.f32 %v2064_v20, %v1755_v23 }
 0x432   : > { %v2069_v39 = vpop.f32.mrf.mxu1  ;;  %v2099_v21 = vpop.f32.mrf.mxu0 }
 0x433   : > { %v1793_v3 = vadd.f32 %v2035_v27, %v1756_v24  ;;  %v2070_v44 = vadd.f32 %v2069_v39, %v2068_v22 }
 0x434   : > { %v2071_v29 = vpop.f32.mrf.mxu1  ;;  %v1758_v30 = vpop.f32.mrf.mxu0 }
 0x435   : > { %v1801_v31 = vmax.f32 %v1793_v3, 0.0  ;;  %v1764_v33 = vadd.f32 %v2098_v6, %v2070_v44  ;;  %v1759_v34 = vadd.f32 %v2067_v28, %v1758_v30 }
 0x436   : > { %v2072_v35 = vpop.f32.mrf.mxu1 }
 0x437   : > { %v1833_v36 = vsel %vm809_vm9, %v1801_v31, %v1810_v17  ;;  %v1795_v37 = vadd.f32 %v2035_v27, %v1764_v33  ;;  %v1794_v38 = vadd.f32 %v2035_v27, %v1759_v34  ;;  %v2073_v46 = vadd.f32 %v2072_v35, %v2071_v29 }
 0x438   : > { %1841 = vst [vmem:[%s3309_s26 + $0x8] sm:$0xff] %v1833_v36  ;;  %v2074_v47 = vpop.f32.mrf.mxu1 }
 0x439   : > { %v1803_v48 = vmax.f32 %v1795_v37, 0.0  ;;  %v1802_v43 = vmax.f32 %v1794_v38, 0.0  ;;  %v1767_v42 = vadd.f32 %v2099_v21, %v2073_v46 }
 0x43a   : > { %v2075_v50 = vpop.f32.mrf.mxu1 }
 0x43b   : > { %v1835_v45 = vsel %vm809_vm9, %v1803_v48, %v1814_v14  ;;  %v1834_v54 = vsel %vm809_vm9, %v1802_v43, %v3298_v13  ;;  %v1796_v56 = vadd.f32 %v2035_v27, %v1767_v42  ;;  %v2076_v14 = vadd.f32 %v2075_v50, %v2074_v47 }
 0x43c   : > { %1843 = vst [vmem:[%s3309_s26 + $0x28] sm:$0xff] %v1835_v45  ;;  %1842 = vst [vmem:[%s3309_s26 + $0x18] sm:$0xff] %v1834_v54  ;;  %v2077_v58 = vpop.f32.mrf.mxu1 }
 0x43d   : > { %v1804_v59 = vmax.f32 %v1796_v56, 0.0 }
 0x43e   : > { %v2078_v62 = vpop.f32.mrf.mxu1 }
 0x43f   : > { %v1836_v60 = vsel %vm809_vm9, %v1804_v59, %v3300_v4  ;;  %v2079_v12 = vadd.f32 %v2078_v62, %v2077_v58 }
 0x440   : > { %1844 = vst [vmem:[%s3309_s26 + $0x38] sm:$0xff] %v1836_v60 }
 0x442   : > { %v2080_v63 = vpop.f32.mrf.mxu1 }
 0x444   : > { %v2081_v0 = vpop.f32.mrf.mxu1 }
 0x445   : > { %v2082_v9 = vadd.f32 %v2081_v0, %v2080_v63 }
 0x446   : > { %v2083_v7 = vpop.f32.mrf.mxu1 }
 0x448   : > { %v2084_v8 = vpop.f32.mrf.mxu1 }
 0x449   : > { %v2085_v53 = vadd.f32 %v2084_v8, %v2083_v7 }
 0x44a   : > { %v2102_v17 = vpop.f32.mrf.mxu1 }
 0x44b   : > { %v1780_v2 = vadd.f32 %v2102_v17, %v2082_v9 }
 0x44c   : > { %v1771_v13 = vpop.f32.mrf.mxu1 }
 0x44d   : > { %v1799_v40 = vadd.f32 %v2035_v27, %v1780_v2  ;;  %v1772_v49 = vadd.f32 %v2076_v14, %v1771_v13 }
 0x44e   : > { %v2103_v61 = vpop.f32.mrf.mxu1 }
 0x44f   : > { %v1807_v4 = vmax.f32 %v1799_v40, 0.0  ;;  %v1797_v52 = vadd.f32 %v2035_v27, %v1772_v49  ;;  %v1783_v19 = vadd.f32 %v2103_v61, %v2085_v53 }
 0x450   : > { %v1774_v32 = vpop.f32.mrf.mxu1 }
 0x451   : > { %v1839_v41 = vsel %vm809_vm9, %v1807_v4, %v1822_v26  ;;  %v1805_v57 = vmax.f32 %v1797_v52, 0.0  ;;  %v1800_v51 = vadd.f32 %v2035_v27, %v1783_v19  ;;  %v1775_v10 = vadd.f32 %v2079_v12, %v1774_v32 }
 0x452   : > { %1847 = vst [vmem:[%s3309_s26 + $0x68] sm:$0xff] %v1839_v41 }
 0x453   : > { %v1837_v11 = vsel %vm809_vm9, %v1805_v57, %v3302_v5  ;;  %v1808_v15 = vmax.f32 %v1800_v51, 0.0  ;;  %v1798_v55 = vadd.f32 %v2035_v27, %v1775_v10 }
 0x454   : > { %1845 = vst [vmem:[%s3309_s26 + $0x48] sm:$0xff] %v1837_v11 }
 0x455   : > { %v1840_v16 = vsel %vm809_vm9, %v1808_v15, %v1824_v18  ;;  %v1806_v25 = vmax.f32 %v1798_v55, 0.0 }
 0x456   : > { %1848 = vst [vmem:[%s3309_s26 + $0x78] sm:$0xff] %v1840_v16 }
 0x457   : > { %v1838_v5 = vsel %vm809_vm9, %v1806_v25, %v3305_v1 }
 0x458   : > { %1846 = vst [vmem:[%s3309_s26 + $0x58] sm:$0xff] %v1838_v5 }
 0x459   : > { %2392 = shalt.err (!%p2389_p5)
}
 0x45a   : > { %s2393_s1 = scalar_lea.hbm %s3357_s19, 2048  ;;  %s2397_s27 = scalar_lea.hbm %s3415_s9, 8192 }
 0x45b   : > { %p2394_p10 = scmp.ne.s32.totalorder %s3357_s19, %s2393_s1  ;;  %p2398_p4 = scmp.lt.s32.totalorder %s3357_s19, %s3415_s9 }
 0x45c   : > { %p2399_p6 = scmp.lt.s32.totalorder %s2397_s27, %s2393_s1 }
 0x45d   : > { %p2395_p9 = pnand %p2394_p10, %p3439_p2 }
 0x45e   : > { %p2400_p8 = por %p2399_p6, %p2398_p4 }
 0x45f   : > { %p2396_p1 = pneg %p2395_p9 }
 0x461   : > { %p2401_p0 = pnand %p2400_p8, %p2396_p1 }
 0x463   : > { %2404 = shalt.err (!%p2401_p0)
}
 0x464   : > { %s2465_s24 = smov 256  }
 0x465   : > { %2118 = dma.vmem_to_hbm [thread:$0]  (%p3439_p2), %s3360_s15, 2048, %s3357_s19, %s1850_s13, %s2465_s24, %s2465_s24, %s2458_s25  }
 0x466 PF: > { %p2140_p7 = scmp.ge.s32.totalorder %s2447_s12, 2  ;;  %s1879_s20 = sand.u32 1, %s2435_s30  }
 0x467   : > { %p3440_p11 = scmp.ne.s32.totalorder %s3425_s16, 0  ;;  %s1880_s14 = scalar_lea.sflag [#allocation4], %s1879_s20 }
 0x469   : > { %p2132_p12 = pnand %p2140_p7, %p3440_p11 }
 0x46b   : > { %p2133_p13 = pneg %p2132_p12 }
 0x46d   : > { %2430 = dma.done.wait (%p2133_p13), %s1880_s14, 2048  }
 0x46e   : > { %2432 = vsyncadd (%p2133_p13), %s1880_s14, 4294965248  ;;  %s3441_s28 = sld [smem:[#allocation12_spill]]  ;;  %p23_p3 = scmp.ge.s32.totalorder %s2590_s21, 6  }
 0x46f   : > { %s3442_s30 = smov %s2439_s10  ;;  %s3443_s10 = smov %s2443_s11 }
 0x470   : > { %s3445_s12 = smov %s2590_s21  ;;  %25 = sbr.rel (!%p23_p3) target bundleno = 9 (0x9), region = 109 }
 0x474   : > { %s3444_s11 = smov %s3441_s28 }
 0x475   :  { %1885 = vsyncpa [#allocation3], 1 }
 0x476   :  { %1887 = vsyncpa [#allocation3 + $0x1], 1 }
 0x477   :  { %1888 = vsyncpa [#allocation6], 1 }
 0x478   :  { %1889 = vsyncpa [#allocation4], 1 }
 0x479   :  { %1891 = vsyncpa [#allocation4 + $0x1], 1 }

</bundles_post_ra>
